<compile_context>
chip_gen: v6e
topology: v6e:2x2x1
jax: 0.10.0
libtpu: 0.0.40
codegen_flags: <defaults>
</compile_context>

<pallas_src>
import functools

import jax
import jax.numpy as jnp
from jax import lax
from jax.experimental import pallas as pl
from jax.experimental.pallas import tpu as pltpu


def _cdiv(a, b):
    return -(-a // b)


# ---------------------------------------------------------------------------
# Fused Pallas kernel (built per-shape via closure)
# ---------------------------------------------------------------------------
def _make_kernel(*, TR, TRo, Wo, Ho, A, S2C, Cp, cdt, skip_r0, skip_c0):
    def kernel(xw_ref, w1_ref, b1_ref, w2_ref, b2_ref, gT_ref, beta_ref,
               ws_ref, bs_ref, o_ref, out1_ref):
        blk = pl.program_id(1)

        # ---- conv1 (3x3, stride s) as A*A dense tap matmuls over s2d input ----
        acc1 = jnp.zeros((TRo * Wo, Cp), jnp.float32)
        for a in range(A):
            for b in range(A):
                xs = xw_ref[a:a + TRo, b:b + Wo, :].reshape(TRo * Wo, S2C)
                acc1 = acc1 + jnp.dot(xs, w1_ref[a * A + b],
                                      preferred_element_type=jnp.float32)
        acc1 = acc1 + b1_ref[...]
        out1 = jnp.where(acc1 >= 0.0, acc1, 0.01 * acc1)          # LeakyReLU
        out1 = out1.reshape(TRo, Wo, Cp)
        # zero out1 rows outside the valid range [0, Ho) (conv2 halo / tail pad)
        row = lax.broadcasted_iota(jnp.int32, (TRo, Wo, Cp), 0) + (blk * TR - 1)
        out1 = jnp.where((row >= 0) & (row < Ho), out1, 0.0)

        # width-padded out1 tile in VMEM (zero halo columns = conv2 padding)
        zcol = jnp.zeros((TRo, 1, Cp), cdt)
        out1_ref[:, 0:1, :] = zcol
        out1_ref[:, Wo + 1:Wo + 2, :] = zcol
        out1_ref[:, 1:Wo + 1, :] = out1.astype(cdt)

        # ---- conv2 (3x3, stride 1) as 9 shifted-slice matmuls ----
        acc2 = jnp.zeros((TR * Wo, Cp), jnp.float32)
        for kh in range(3):
            for kw in range(3):
                o1 = out1_ref[kh:kh + TR, kw:kw + Wo, :].reshape(TR * Wo, Cp)
                acc2 = acc2 + jnp.dot(o1, w2_ref[kh * 3 + kw],
                                      preferred_element_type=jnp.float32)
        out2 = acc2 + b2_ref[...]

        # ---- GDN: y = out2 * rsqrt(beta + gamma @ out2^2) (f32 elementwise) ----
        norm = jnp.dot((out2 * out2).astype(cdt), gT_ref[...],
                       preferred_element_type=jnp.float32) + beta_ref[...]
        y = out2 * lax.rsqrt(norm)

        # ---- skip 1x1 stride-s conv: center tap of the conv1 input tile ----
        xc = xw_ref[skip_r0:skip_r0 + TR,
                    skip_c0:skip_c0 + Wo, :].reshape(TR * Wo, S2C)
        ident = jnp.dot(xc, ws_ref[...],
                        preferred_element_type=jnp.float32) + bs_ref[...]

        o_ref[...] = (y + ident).reshape(TR, Wo, Cp).astype(o_ref.dtype)

    return kernel


# ---------------------------------------------------------------------------
# Wrapper: layout plumbing (NCHW <-> NHWC, padding, space-to-depth, weights)
# ---------------------------------------------------------------------------
def residual_block_with_stride(x_nchw, params, stride=2, row_tile=None,
                               use_bf16=True, vmem_limit_bytes=None):
    s = int(stride)
    w1, b1 = params["w1"], params["b1"]
    w2, b2 = params["w2"], params["b2"]
    gamma, beta = params["gamma"], params["beta"]
    ws, bs = params["ws"], params["bs"]

    N, Cin, H, W = x_nchw.shape
    Cout = w1.shape[0]
    Ho = (H + 2 - 3) // s + 1
    Wo = (W + 2 - 3) // s + 1
    A = _cdiv(3, s)                       # s2d spatial taps per axis
    S2C = s * s * Cin                     # s2d channel count
    Cp = _cdiv(Cout, 128) * 128           # lane-dense output channels
    cdt = jnp.bfloat16 if use_bf16 else jnp.float32

    # Row tile: target a few hundred matmul rows per grid step.
    if row_tile is None:
        row_tile = max(1, min(Ho, _cdiv(512, max(Wo, 1))))
    TR = int(row_tile)
    NB = _cdiv(Ho, TR)
    TRo = TR + 2                          # out1 rows incl. conv2 halo
    TRh = TR + A + 1                      # s2d input rows per block

    # ---- NHWC, zero-pad, space-to-depth (s x s phase split) -----------------
    x = jnp.transpose(x_nchw, (0, 2, 3, 1))
    Hs2d = NB * TR + A + 1
    Ws2d = max(Wo + A - 1, _cdiv(W + 2, s))
    pad_t, pad_b = s + 1, s * Hs2d - H - (s + 1)
    pad_l, pad_r = 1, s * Ws2d - W - 1
    xp = jnp.pad(x, ((0, 0), (pad_t, pad_b), (pad_l, pad_r), (0, 0)))
    x_s2d = xp.reshape(N, Hs2d, s, Ws2d, s, Cin)
    x_s2d = x_s2d.transpose(0, 1, 3, 2, 4, 5).reshape(N, Hs2d, Ws2d, S2C)
    # Overlapping row windows (halo of A+1 rows) so the kernel keeps simple,
    # auto-pipelined BlockSpecs.  Overhead ~ (A+1)/TR extra input bytes; a
    # production variant could replace this with manual halo DMA (pl.ANY).
    ridx = jnp.arange(NB)[:, None] * TR + jnp.arange(TRh)[None, :]
    x_win = x_s2d[:, ridx].astype(cdt)    # (N, NB, TRh, Ws2d, S2C)

    # ---- conv1 weights combined per s2d spatial offset: (A*A, S2C, Cp) ------
    w1c = jnp.zeros((A, A, s, s, Cin, Cp), jnp.float32)
    for kh in range(3):
        for kw in range(3):
            a, ph = kh // s, kh % s
            b, pw = kw // s, kw % s
            w1c = w1c.at[a, b, ph, pw, :, :Cout].set(w1[:, :, kh, kw].T)
    w1c = w1c.reshape(A * A, S2C, Cp).astype(cdt)
    b1p = jnp.zeros((1, Cp), jnp.float32).at[0, :Cout].set(b1)

    # ---- conv2 weights, one (Cp, Cp) matrix per tap --------------------------
    w2t = jnp.zeros((9, Cp, Cp), jnp.float32)
    for kh in range(3):
        for kw in range(3):
            w2t = w2t.at[kh * 3 + kw, :Cout, :Cout].set(w2[:, :, kh, kw].T)
    w2t = w2t.astype(cdt)
    b2p = jnp.zeros((1, Cp), jnp.float32).at[0, :Cout].set(b2)

    # ---- GDN params (padded channels: gamma=0, beta=1 -> finite rsqrt) ------
    gTp = jnp.zeros((Cp, Cp), jnp.float32).at[:Cout, :Cout].set(gamma.T).astype(cdt)
    betap = jnp.ones((1, Cp), jnp.float32).at[0, :Cout].set(beta)

    # ---- skip 1x1 weights embedded at the center-tap phase ------------------
    a_c, ph_c = 1 // s, 1 % s
    pidx = ph_c * s + ph_c
    ws2 = jnp.zeros((S2C, Cp), jnp.float32)
    ws2 = ws2.at[pidx * Cin:(pidx + 1) * Cin, :Cout].set(ws[:, :, 0, 0].T)
    ws2 = ws2.astype(cdt)
    bsp = jnp.zeros((1, Cp), jnp.float32).at[0, :Cout].set(bs)

    kernel = _make_kernel(TR=TR, TRo=TRo, Wo=Wo, Ho=Ho, A=A, S2C=S2C, Cp=Cp,
                          cdt=cdt, skip_r0=1 + a_c, skip_c0=a_c)

    grid_spec = pltpu.PrefetchScalarGridSpec(
        num_scalar_prefetch=0,
        grid=(N, NB),
        in_specs=[
            pl.BlockSpec((None, None, TRh, Ws2d, S2C),
                         lambda n, b: (n, b, 0, 0, 0)),
            pl.BlockSpec((A * A, S2C, Cp), lambda n, b: (0, 0, 0)),
            pl.BlockSpec((1, Cp), lambda n, b: (0, 0)),
            pl.BlockSpec((9, Cp, Cp), lambda n, b: (0, 0, 0)),
            pl.BlockSpec((1, Cp), lambda n, b: (0, 0)),
            pl.BlockSpec((Cp, Cp), lambda n, b: (0, 0)),
            pl.BlockSpec((1, Cp), lambda n, b: (0, 0)),
            pl.BlockSpec((S2C, Cp), lambda n, b: (0, 0)),
            pl.BlockSpec((1, Cp), lambda n, b: (0, 0)),
        ],
        out_specs=pl.BlockSpec((None, TR, Wo, Cp), lambda n, b: (n, b, 0, 0)),
        scratch_shapes=[pltpu.VMEM((TRo, Wo + 2, Cp), cdt)],
    )

    out_p = pl.pallas_call(
        kernel,
        out_shape=jax.ShapeDtypeStruct((N, NB * TR, Wo, Cp), jnp.float32),
        grid_spec=grid_spec,
        compiler_params=pltpu.CompilerParams(
            dimension_semantics=("parallel", "parallel"),
            vmem_limit_bytes=vmem_limit_bytes),
    )(x_win, w1c, b1p, w2t, b2p, gTp, betap, ws2, bsp)

    out = out_p[:, :Ho, :, :Cout]                 # drop row / channel padding
    return jnp.transpose(out, (0, 3, 1, 2))       # back to NCHW


# ---------------------------------------------------------------------------
# Pure-JAX reference (mirrors the PyTorch forward exactly)
# ---------------------------------------------------------------------------
def _ref_forward(x, params, stride=2):
    dn = ("NCHW", "OIHW", "NCHW")
    w1, b1, w2, b2, gamma, beta, ws, bs = (
        params["w1"], params["b1"], params["w2"], params["b2"],
        params["gamma"], params["beta"], params["ws"], params["bs"])
    out = lax.conv_general_dilated(x, w1, (stride, stride), ((1, 1), (1, 1)),
                                   dimension_numbers=dn) + b1[None, :, None, None]
    out = jnp.where(out >= 0, out, 0.01 * out)
    out = lax.conv_general_dilated(out, w2, (1, 1), ((1, 1), (1, 1)),
                                   dimension_numbers=dn) + b2[None, :, None, None]
    norm = lax.conv_general_dilated(out * out, gamma[:, :, None, None], (1, 1),
                                    ((0, 0), (0, 0)), dimension_numbers=dn)
    norm = norm + beta[None, :, None, None]
    out = out * lax.rsqrt(norm)
    identity = lax.conv_general_dilated(x, ws, (stride, stride), ((0, 0), (0, 0)),
                                        dimension_numbers=dn) + bs[None, :, None, None]
    return out + identity


# ---------------------------------------------------------------------------
if __name__ == "__main__":
    N, Cin, H, W = 2, 4, 16, 16
    Cout, stride = 8, 2

    key = jax.random.PRNGKey(0)
    kx, k1, kb1, k2, kb2, k3, kb3 = jax.random.split(key, 7)

    x = jax.random.normal(kx, (N, Cin, H, W), jnp.float32)

    params = {
        "w1": jax.random.normal(k1, (Cout, Cin, 3, 3), jnp.float32) * 0.1,
        "b1": jax.random.normal(kb1, (Cout,), jnp.float32) * 0.1,
        "w2": jax.random.normal(k2, (Cout, Cout, 3, 3), jnp.float32) * 0.1,
        "b2": jax.random.normal(kb2, (Cout,), jnp.float32) * 0.1,
        # GDN init (compressai): gamma = 0.1 * I, beta = 1 (already positive)
        "gamma": 0.1 * jnp.eye(Cout, dtype=jnp.float32),
        "beta": jnp.ones((Cout,), jnp.float32),
        "ws": jax.random.normal(k3, (Cout, Cin, 1, 1), jnp.float32) * 0.1,
        "bs": jax.random.normal(kb3, (Cout,), jnp.float32) * 0.1,
    }

    ref = jax.block_until_ready(_ref_forward(x, params, stride=stride))

    # f32 path: tight structural-correctness check.
    f32_fwd = jax.jit(functools.partial(residual_block_with_stride,
                                        stride=stride, use_bf16=False))
    out_f32 = jax.block_until_ready(f32_fwd(x, params))
    assert out_f32.shape == (N, Cout, H // stride, W // stride), out_f32.shape
    assert jnp.allclose(out_f32, ref, atol=5e-4, rtol=5e-4), \
        float(jnp.max(jnp.abs(out_f32 - ref)))

    # bf16-MXU path (default; v6e/v7x): looser numeric check.
    bf16_fwd = jax.jit(functools.partial(residual_block_with_stride,
                                         stride=stride, use_bf16=True))
    out_bf16 = jax.block_until_ready(bf16_fwd(x, params))
    assert out_bf16.shape == (N, Cout, H // stride, W // stride), out_bf16.shape
    assert jnp.allclose(out_bf16, ref, atol=5e-2, rtol=5e-2), \
        float(jnp.max(jnp.abs(out_bf16 - ref)))

    print("KERNEL_OK")
</pallas_src>

<mosaic_0001>
module attributes {stable_mosaic.version = 11 : i64} {
  func.func @kernel(%arg0: i32, %arg1: i32, %arg2: memref<1x1x11x9x16xf32, #tpu.memory_space<vmem>>, %arg3: memref<4x16x128xf32, #tpu.memory_space<vmem>>, %arg4: memref<1x128xf32, #tpu.memory_space<vmem>>, %arg5: memref<9x128x128xf32, #tpu.memory_space<vmem>>, %arg6: memref<1x128xf32, #tpu.memory_space<vmem>>, %arg7: memref<128x128xf32, #tpu.memory_space<vmem>>, %arg8: memref<1x128xf32, #tpu.memory_space<vmem>>, %arg9: memref<16x128xf32, #tpu.memory_space<vmem>>, %arg10: memref<1x128xf32, #tpu.memory_space<vmem>>, %arg11: memref<1x8x8x128xf32, #tpu.memory_space<vmem>>, %arg12: memref<10x10x128xf32, #tpu.memory_space<vmem>>) attributes {dimension_semantics = [#tpu.dimension_semantics<parallel>, #tpu.dimension_semantics<parallel>], iteration_bounds = array<i64: 2, 1>, scalar_prefetch = 0 : i64, scratch_operands = 1 : i64, tpu.core_type = #tpu.core_type<tc>, window_params = [{transform_indices = @transform_0, window_bounds = array<i64: 1, 1, 11, 9, 16>}, {pipeline_mode = #tpu.pipeline_mode<synchronous>, transform_indices = @transform_1, window_bounds = array<i64: 4, 16, 128>}, {pipeline_mode = #tpu.pipeline_mode<synchronous>, transform_indices = @transform_2, window_bounds = array<i64: 1, 128>}, {pipeline_mode = #tpu.pipeline_mode<synchronous>, transform_indices = @transform_3, window_bounds = array<i64: 9, 128, 128>}, {pipeline_mode = #tpu.pipeline_mode<synchronous>, transform_indices = @transform_4, window_bounds = array<i64: 1, 128>}, {pipeline_mode = #tpu.pipeline_mode<synchronous>, transform_indices = @transform_5, window_bounds = array<i64: 128, 128>}, {pipeline_mode = #tpu.pipeline_mode<synchronous>, transform_indices = @transform_6, window_bounds = array<i64: 1, 128>}, {pipeline_mode = #tpu.pipeline_mode<synchronous>, transform_indices = @transform_7, window_bounds = array<i64: 16, 128>}, {pipeline_mode = #tpu.pipeline_mode<synchronous>, transform_indices = @transform_8, window_bounds = array<i64: 1, 128>}, {transform_indices = @transform_9, window_bounds = array<i64: 1, 8, 8, 128>}]} {
    %cst = arith.constant 0.000000e+00 : f32
    %0 = vector.broadcast %cst : f32 to vector<80x128xf32>
    %c0 = arith.constant 0 : index
    %c0_0 = arith.constant 0 : index
    %c0_1 = arith.constant 0 : index
    %c0_2 = arith.constant 0 : index
    %c0_3 = arith.constant 0 : index
    %1 = vector.load %arg2[%c0, %c0_0, %c0_1, %c0_2, %c0_3] : memref<1x1x11x9x16xf32, #tpu.memory_space<vmem>>, vector<1x1x10x8x16xf32>
    %2 = vector.shape_cast %1 : vector<1x1x10x8x16xf32> to vector<10x8x16xf32>
    %3 = vector.shape_cast %2 : vector<10x8x16xf32> to vector<80x16xf32>
    %c0_4 = arith.constant 0 : index
    %c0_5 = arith.constant 0 : index
    %c0_6 = arith.constant 0 : index
    %4 = vector.load %arg3[%c0_4, %c0_5, %c0_6] : memref<4x16x128xf32, #tpu.memory_space<vmem>>, vector<1x16x128xf32>
    %5 = vector.shape_cast %4 : vector<1x16x128xf32> to vector<16x128xf32>
    %cst_7 = arith.constant dense<0.000000e+00> : vector<80x128xf32>
    %6 = tpu.matmul %3, %5, %cst_7 {dimension_numbers = #tpu.dot_dimension_numbers<[1], [0], [0], [1], [0, 0, 1, 1], [], []>} : vector<80x16xf32>, vector<16x128xf32>, vector<80x128xf32> -> vector<80x128xf32>
    %7 = arith.addf %0, %6 : vector<80x128xf32>
    %c0_8 = arith.constant 0 : index
    %c0_9 = arith.constant 0 : index
    %c0_10 = arith.constant 0 : index
    %c1 = arith.constant 1 : index
    %c0_11 = arith.constant 0 : index
    %8 = vector.load %arg2[%c0_8, %c0_9, %c0_10, %c1, %c0_11] : memref<1x1x11x9x16xf32, #tpu.memory_space<vmem>>, vector<1x1x10x8x16xf32>
    %9 = vector.shape_cast %8 : vector<1x1x10x8x16xf32> to vector<10x8x16xf32>
    %10 = vector.shape_cast %9 : vector<10x8x16xf32> to vector<80x16xf32>
    %c1_12 = arith.constant 1 : index
    %c0_13 = arith.constant 0 : index
    %c0_14 = arith.constant 0 : index
    %11 = vector.load %arg3[%c1_12, %c0_13, %c0_14] : memref<4x16x128xf32, #tpu.memory_space<vmem>>, vector<1x16x128xf32>
    %12 = vector.shape_cast %11 : vector<1x16x128xf32> to vector<16x128xf32>
    %cst_15 = arith.constant dense<0.000000e+00> : vector<80x128xf32>
    %13 = tpu.matmul %10, %12, %cst_15 {dimension_numbers = #tpu.dot_dimension_numbers<[1], [0], [0], [1], [0, 0, 1, 1], [], []>} : vector<80x16xf32>, vector<16x128xf32>, vector<80x128xf32> -> vector<80x128xf32>
    %14 = arith.addf %7, %13 : vector<80x128xf32>
    %c0_16 = arith.constant 0 : index
    %c0_17 = arith.constant 0 : index
    %c1_18 = arith.constant 1 : index
    %c0_19 = arith.constant 0 : index
    %c0_20 = arith.constant 0 : index
    %15 = vector.load %arg2[%c0_16, %c0_17, %c1_18, %c0_19, %c0_20] : memref<1x1x11x9x16xf32, #tpu.memory_space<vmem>>, vector<1x1x10x8x16xf32>
    %16 = vector.shape_cast %15 : vector<1x1x10x8x16xf32> to vector<10x8x16xf32>
    %17 = vector.shape_cast %16 : vector<10x8x16xf32> to vector<80x16xf32>
    %c2 = arith.constant 2 : index
    %c0_21 = arith.constant 0 : index
    %c0_22 = arith.constant 0 : index
    %18 = vector.load %arg3[%c2, %c0_21, %c0_22] : memref<4x16x128xf32, #tpu.memory_space<vmem>>, vector<1x16x128xf32>
    %19 = vector.shape_cast %18 : vector<1x16x128xf32> to vector<16x128xf32>
    %cst_23 = arith.constant dense<0.000000e+00> : vector<80x128xf32>
    %20 = tpu.matmul %17, %19, %cst_23 {dimension_numbers = #tpu.dot_dimension_numbers<[1], [0], [0], [1], [0, 0, 1, 1], [], []>} : vector<80x16xf32>, vector<16x128xf32>, vector<80x128xf32> -> vector<80x128xf32>
    %21 = arith.addf %14, %20 : vector<80x128xf32>
    %c0_24 = arith.constant 0 : index
    %c0_25 = arith.constant 0 : index
    %c1_26 = arith.constant 1 : index
    %c1_27 = arith.constant 1 : index
    %c0_28 = arith.constant 0 : index
    %22 = vector.load %arg2[%c0_24, %c0_25, %c1_26, %c1_27, %c0_28] : memref<1x1x11x9x16xf32, #tpu.memory_space<vmem>>, vector<1x1x10x8x16xf32>
    %23 = vector.shape_cast %22 : vector<1x1x10x8x16xf32> to vector<10x8x16xf32>
    %24 = vector.shape_cast %23 : vector<10x8x16xf32> to vector<80x16xf32>
    %c3 = arith.constant 3 : index
    %c0_29 = arith.constant 0 : index
    %c0_30 = arith.constant 0 : index
    %25 = vector.load %arg3[%c3, %c0_29, %c0_30] : memref<4x16x128xf32, #tpu.memory_space<vmem>>, vector<1x16x128xf32>
    %26 = vector.shape_cast %25 : vector<1x16x128xf32> to vector<16x128xf32>
    %cst_31 = arith.constant dense<0.000000e+00> : vector<80x128xf32>
    %27 = tpu.matmul %24, %26, %cst_31 {dimension_numbers = #tpu.dot_dimension_numbers<[1], [0], [0], [1], [0, 0, 1, 1], [], []>} : vector<80x16xf32>, vector<16x128xf32>, vector<80x128xf32> -> vector<80x128xf32>
    %28 = arith.addf %21, %27 : vector<80x128xf32>
    %c0_32 = arith.constant 0 : index
    %c0_33 = arith.constant 0 : index
    %29 = vector.load %arg4[%c0_32, %c0_33] : memref<1x128xf32, #tpu.memory_space<vmem>>, vector<1x128xf32>
    %30 = vector.broadcast %29 : vector<1x128xf32> to vector<80x128xf32>
    %31 = arith.addf %28, %30 : vector<80x128xf32>
    %cst_34 = arith.constant 0.000000e+00 : f32
    %32 = vector.broadcast %cst_34 : f32 to vector<80x128xf32>
    %33 = arith.cmpf oge, %31, %32 : vector<80x128xf32>
    %cst_35 = arith.constant 0.00999999977 : f32
    %34 = vector.broadcast %cst_35 : f32 to vector<80x128xf32>
    %35 = arith.mulf %34, %31 : vector<80x128xf32>
    %36 = arith.select %33, %31, %35 : vector<80x128xi1>, vector<80x128xf32>
    %37 = vector.shape_cast %36 : vector<80x128xf32> to vector<10x8x128xf32>
    %38 = tpu.iota {dimensions = array<i32: 0>} : vector<10x8x128xi32>
    %c8_i32 = arith.constant 8 : i32
    %39 = arith.muli %arg1, %c8_i32 : i32
    %c1_i32 = arith.constant 1 : i32
    %40 = arith.subi %39, %c1_i32 : i32
    %41 = vector.broadcast %40 : i32 to vector<10x8x128xi32>
    %42 = arith.addi %38, %41 : vector<10x8x128xi32>
    %c0_i32 = arith.constant 0 : i32
    %43 = vector.broadcast %c0_i32 : i32 to vector<10x8x128xi32>
    %44 = arith.cmpi sge, %42, %43 : vector<10x8x128xi32>
    %c8_i32_36 = arith.constant 8 : i32
    %45 = vector.broadcast %c8_i32_36 : i32 to vector<10x8x128xi32>
    %46 = arith.cmpi slt, %42, %45 : vector<10x8x128xi32>
    %47 = arith.andi %44, %46 : vector<10x8x128xi1>
    %cst_37 = arith.constant 0.000000e+00 : f32
    %48 = vector.broadcast %cst_37 : f32 to vector<10x8x128xf32>
    %49 = arith.select %47, %37, %48 : vector<10x8x128xi1>, vector<10x8x128xf32>
    %cst_38 = arith.constant 0.000000e+00 : f32
    %50 = vector.broadcast %cst_38 : f32 to vector<10x1x128xf32>
    %c0_39 = arith.constant 0 : index
    %c0_40 = arith.constant 0 : index
    %c0_41 = arith.constant 0 : index
    %51 = vector.load %arg12[%c0_39, %c0_40, %c0_41] : memref<10x10x128xf32, #tpu.memory_space<vmem>>, vector<10x1x128xf32>
    tpu.vector_store %arg12[%c0_39, %c0_40, %c0_41], %50 {strides = array<i32>} : memref<10x10x128xf32, #tpu.memory_space<vmem>>, vector<10x1x128xf32>,
    %c0_42 = arith.constant 0 : index
    %c9 = arith.constant 9 : index
    %c0_43 = arith.constant 0 : index
    %52 = vector.load %arg12[%c0_42, %c9, %c0_43] : memref<10x10x128xf32, #tpu.memory_space<vmem>>, vector<10x1x128xf32>
    tpu.vector_store %arg12[%c0_42, %c9, %c0_43], %50 {strides = array<i32>} : memref<10x10x128xf32, #tpu.memory_space<vmem>>, vector<10x1x128xf32>,
    %c0_44 = arith.constant 0 : index
    %c1_45 = arith.constant 1 : index
    %c0_46 = arith.constant 0 : index
    %53 = vector.load %arg12[%c0_44, %c1_45, %c0_46] : memref<10x10x128xf32, #tpu.memory_space<vmem>>, vector<10x8x128xf32>
    tpu.vector_store %arg12[%c0_44, %c1_45, %c0_46], %49 {strides = array<i32>} : memref<10x10x128xf32, #tpu.memory_space<vmem>>, vector<10x8x128xf32>,
    %cst_47 = arith.constant 0.000000e+00 : f32
    %54 = vector.broadcast %cst_47 : f32 to vector<64x128xf32>
    %c0_48 = arith.constant 0 : index
    %c0_49 = arith.constant 0 : index
    %c0_50 = arith.constant 0 : index
    %55 = vector.load %arg12[%c0_48, %c0_49, %c0_50] : memref<10x10x128xf32, #tpu.memory_space<vmem>>, vector<8x8x128xf32>
    %56 = vector.shape_cast %55 : vector<8x8x128xf32> to vector<64x128xf32>
    %c0_51 = arith.constant 0 : index
    %c0_52 = arith.constant 0 : index
    %c0_53 = arith.constant 0 : index
    %57 = vector.load %arg5[%c0_51, %c0_52, %c0_53] : memref<9x128x128xf32, #tpu.memory_space<vmem>>, vector<1x128x128xf32>
    %58 = vector.shape_cast %57 : vector<1x128x128xf32> to vector<128x128xf32>
    %cst_54 = arith.constant dense<0.000000e+00> : vector<64x128xf32>
    %59 = tpu.matmul %56, %58, %cst_54 {dimension_numbers = #tpu.dot_dimension_numbers<[1], [0], [0], [1], [0, 0, 1, 1], [], []>} : vector<64x128xf32>, vector<128x128xf32>, vector<64x128xf32> -> vector<64x128xf32>
    %60 = arith.addf %54, %59 : vector<64x128xf32>
    %c0_55 = arith.constant 0 : index
    %c1_56 = arith.constant 1 : index
    %c0_57 = arith.constant 0 : index
    %61 = vector.load %arg12[%c0_55, %c1_56, %c0_57] : memref<10x10x128xf32, #tpu.memory_space<vmem>>, vector<8x8x128xf32>
    %62 = vector.shape_cast %61 : vector<8x8x128xf32> to vector<64x128xf32>
    %c1_58 = arith.constant 1 : index
    %c0_59 = arith.constant 0 : index
    %c0_60 = arith.constant 0 : index
    %63 = vector.load %arg5[%c1_58, %c0_59, %c0_60] : memref<9x128x128xf32, #tpu.memory_space<vmem>>, vector<1x128x128xf32>
    %64 = vector.shape_cast %63 : vector<1x128x128xf32> to vector<128x128xf32>
    %cst_61 = arith.constant dense<0.000000e+00> : vector<64x128xf32>
    %65 = tpu.matmul %62, %64, %cst_61 {dimension_numbers = #tpu.dot_dimension_numbers<[1], [0], [0], [1], [0, 0, 1, 1], [], []>} : vector<64x128xf32>, vector<128x128xf32>, vector<64x128xf32> -> vector<64x128xf32>
    %66 = arith.addf %60, %65 : vector<64x128xf32>
    %c0_62 = arith.constant 0 : index
    %c2_63 = arith.constant 2 : index
    %c0_64 = arith.constant 0 : index
    %67 = vector.load %arg12[%c0_62, %c2_63, %c0_64] : memref<10x10x128xf32, #tpu.memory_space<vmem>>, vector<8x8x128xf32>
    %68 = vector.shape_cast %67 : vector<8x8x128xf32> to vector<64x128xf32>
    %c2_65 = arith.constant 2 : index
    %c0_66 = arith.constant 0 : index
    %c0_67 = arith.constant 0 : index
    %69 = vector.load %arg5[%c2_65, %c0_66, %c0_67] : memref<9x128x128xf32, #tpu.memory_space<vmem>>, vector<1x128x128xf32>
    %70 = vector.shape_cast %69 : vector<1x128x128xf32> to vector<128x128xf32>
    %cst_68 = arith.constant dense<0.000000e+00> : vector<64x128xf32>
    %71 = tpu.matmul %68, %70, %cst_68 {dimension_numbers = #tpu.dot_dimension_numbers<[1], [0], [0], [1], [0, 0, 1, 1], [], []>} : vector<64x128xf32>, vector<128x128xf32>, vector<64x128xf32> -> vector<64x128xf32>
    %72 = arith.addf %66, %71 : vector<64x128xf32>
    %c1_69 = arith.constant 1 : index
    %c0_70 = arith.constant 0 : index
    %c0_71 = arith.constant 0 : index
    %73 = vector.load %arg12[%c1_69, %c0_70, %c0_71] : memref<10x10x128xf32, #tpu.memory_space<vmem>>, vector<8x8x128xf32>
    %74 = vector.shape_cast %73 : vector<8x8x128xf32> to vector<64x128xf32>
    %c3_72 = arith.constant 3 : index
    %c0_73 = arith.constant 0 : index
    %c0_74 = arith.constant 0 : index
    %75 = vector.load %arg5[%c3_72, %c0_73, %c0_74] : memref<9x128x128xf32, #tpu.memory_space<vmem>>, vector<1x128x128xf32>
    %76 = vector.shape_cast %75 : vector<1x128x128xf32> to vector<128x128xf32>
    %cst_75 = arith.constant dense<0.000000e+00> : vector<64x128xf32>
    %77 = tpu.matmul %74, %76, %cst_75 {dimension_numbers = #tpu.dot_dimension_numbers<[1], [0], [0], [1], [0, 0, 1, 1], [], []>} : vector<64x128xf32>, vector<128x128xf32>, vector<64x128xf32> -> vector<64x128xf32>
    %78 = arith.addf %72, %77 : vector<64x128xf32>
    %c1_76 = arith.constant 1 : index
    %c1_77 = arith.constant 1 : index
    %c0_78 = arith.constant 0 : index
    %79 = vector.load %arg12[%c1_76, %c1_77, %c0_78] : memref<10x10x128xf32, #tpu.memory_space<vmem>>, vector<8x8x128xf32>
    %80 = vector.shape_cast %79 : vector<8x8x128xf32> to vector<64x128xf32>
    %c4 = arith.constant 4 : index
    %c0_79 = arith.constant 0 : index
    %c0_80 = arith.constant 0 : index
    %81 = vector.load %arg5[%c4, %c0_79, %c0_80] : memref<9x128x128xf32, #tpu.memory_space<vmem>>, vector<1x128x128xf32>
    %82 = vector.shape_cast %81 : vector<1x128x128xf32> to vector<128x128xf32>
    %cst_81 = arith.constant dense<0.000000e+00> : vector<64x128xf32>
    %83 = tpu.matmul %80, %82, %cst_81 {dimension_numbers = #tpu.dot_dimension_numbers<[1], [0], [0], [1], [0, 0, 1, 1], [], []>} : vector<64x128xf32>, vector<128x128xf32>, vector<64x128xf32> -> vector<64x128xf32>
    %84 = arith.addf %78, %83 : vector<64x128xf32>
    %c1_82 = arith.constant 1 : index
    %c2_83 = arith.constant 2 : index
    %c0_84 = arith.constant 0 : index
    %85 = vector.load %arg12[%c1_82, %c2_83, %c0_84] : memref<10x10x128xf32, #tpu.memory_space<vmem>>, vector<8x8x128xf32>
    %86 = vector.shape_cast %85 : vector<8x8x128xf32> to vector<64x128xf32>
    %c5 = arith.constant 5 : index
    %c0_85 = arith.constant 0 : index
    %c0_86 = arith.constant 0 : index
    %87 = vector.load %arg5[%c5, %c0_85, %c0_86] : memref<9x128x128xf32, #tpu.memory_space<vmem>>, vector<1x128x128xf32>
    %88 = vector.shape_cast %87 : vector<1x128x128xf32> to vector<128x128xf32>
    %cst_87 = arith.constant dense<0.000000e+00> : vector<64x128xf32>
    %89 = tpu.matmul %86, %88, %cst_87 {dimension_numbers = #tpu.dot_dimension_numbers<[1], [0], [0], [1], [0, 0, 1, 1], [], []>} : vector<64x128xf32>, vector<128x128xf32>, vector<64x128xf32> -> vector<64x128xf32>
    %90 = arith.addf %84, %89 : vector<64x128xf32>
    %c2_88 = arith.constant 2 : index
    %c0_89 = arith.constant 0 : index
    %c0_90 = arith.constant 0 : index
    %91 = vector.load %arg12[%c2_88, %c0_89, %c0_90] : memref<10x10x128xf32, #tpu.memory_space<vmem>>, vector<8x8x128xf32>
    %92 = vector.shape_cast %91 : vector<8x8x128xf32> to vector<64x128xf32>
    %c6 = arith.constant 6 : index
    %c0_91 = arith.constant 0 : index
    %c0_92 = arith.constant 0 : index
    %93 = vector.load %arg5[%c6, %c0_91, %c0_92] : memref<9x128x128xf32, #tpu.memory_space<vmem>>, vector<1x128x128xf32>
    %94 = vector.shape_cast %93 : vector<1x128x128xf32> to vector<128x128xf32>
    %cst_93 = arith.constant dense<0.000000e+00> : vector<64x128xf32>
    %95 = tpu.matmul %92, %94, %cst_93 {dimension_numbers = #tpu.dot_dimension_numbers<[1], [0], [0], [1], [0, 0, 1, 1], [], []>} : vector<64x128xf32>, vector<128x128xf32>, vector<64x128xf32> -> vector<64x128xf32>
    %96 = arith.addf %90, %95 : vector<64x128xf32>
    %c2_94 = arith.constant 2 : index
    %c1_95 = arith.constant 1 : index
    %c0_96 = arith.constant 0 : index
    %97 = vector.load %arg12[%c2_94, %c1_95, %c0_96] : memref<10x10x128xf32, #tpu.memory_space<vmem>>, vector<8x8x128xf32>
    %98 = vector.shape_cast %97 : vector<8x8x128xf32> to vector<64x128xf32>
    %c7 = arith.constant 7 : index
    %c0_97 = arith.constant 0 : index
    %c0_98 = arith.constant 0 : index
    %99 = vector.load %arg5[%c7, %c0_97, %c0_98] : memref<9x128x128xf32, #tpu.memory_space<vmem>>, vector<1x128x128xf32>
    %100 = vector.shape_cast %99 : vector<1x128x128xf32> to vector<128x128xf32>
    %cst_99 = arith.constant dense<0.000000e+00> : vector<64x128xf32>
    %101 = tpu.matmul %98, %100, %cst_99 {dimension_numbers = #tpu.dot_dimension_numbers<[1], [0], [0], [1], [0, 0, 1, 1], [], []>} : vector<64x128xf32>, vector<128x128xf32>, vector<64x128xf32> -> vector<64x128xf32>
    %102 = arith.addf %96, %101 : vector<64x128xf32>
    %c2_100 = arith.constant 2 : index
    %c2_101 = arith.constant 2 : index
    %c0_102 = arith.constant 0 : index
    %103 = vector.load %arg12[%c2_100, %c2_101, %c0_102] : memref<10x10x128xf32, #tpu.memory_space<vmem>>, vector<8x8x128xf32>
    %104 = vector.shape_cast %103 : vector<8x8x128xf32> to vector<64x128xf32>
    %c8 = arith.constant 8 : index
    %c0_103 = arith.constant 0 : index
    %c0_104 = arith.constant 0 : index
    %105 = vector.load %arg5[%c8, %c0_103, %c0_104] : memref<9x128x128xf32, #tpu.memory_space<vmem>>, vector<1x128x128xf32>
    %106 = vector.shape_cast %105 : vector<1x128x128xf32> to vector<128x128xf32>
    %cst_105 = arith.constant dense<0.000000e+00> : vector<64x128xf32>
    %107 = tpu.matmul %104, %106, %cst_105 {dimension_numbers = #tpu.dot_dimension_numbers<[1], [0], [0], [1], [0, 0, 1, 1], [], []>} : vector<64x128xf32>, vector<128x128xf32>, vector<64x128xf32> -> vector<64x128xf32>
    %108 = arith.addf %102, %107 : vector<64x128xf32>
    %c0_106 = arith.constant 0 : index
    %c0_107 = arith.constant 0 : index
    %109 = vector.load %arg6[%c0_106, %c0_107] : memref<1x128xf32, #tpu.memory_space<vmem>>, vector<1x128xf32>
    %110 = vector.broadcast %109 : vector<1x128xf32> to vector<64x128xf32>
    %111 = arith.addf %108, %110 : vector<64x128xf32>
    %112 = arith.mulf %111, %111 : vector<64x128xf32>
    %c0_108 = arith.constant 0 : index
    %c0_109 = arith.constant 0 : index
    %113 = vector.load %arg7[%c0_108, %c0_109] : memref<128x128xf32, #tpu.memory_space<vmem>>, vector<128x128xf32>
    %cst_110 = arith.constant dense<0.000000e+00> : vector<64x128xf32>
    %114 = tpu.matmul %112, %113, %cst_110 {dimension_numbers = #tpu.dot_dimension_numbers<[1], [0], [0], [1], [0, 0, 1, 1], [], []>} : vector<64x128xf32>, vector<128x128xf32>, vector<64x128xf32> -> vector<64x128xf32>
    %c0_111 = arith.constant 0 : index
    %c0_112 = arith.constant 0 : index
    %115 = vector.load %arg8[%c0_111, %c0_112] : memref<1x128xf32, #tpu.memory_space<vmem>>, vector<1x128xf32>
    %116 = vector.broadcast %115 : vector<1x128xf32> to vector<64x128xf32>
    %117 = arith.addf %114, %116 : vector<64x128xf32>
    %118 = math.rsqrt %117 : vector<64x128xf32>
    %119 = arith.mulf %111, %118 : vector<64x128xf32>
    %c0_113 = arith.constant 0 : index
    %c0_114 = arith.constant 0 : index
    %c1_115 = arith.constant 1 : index
    %c0_116 = arith.constant 0 : index
    %c0_117 = arith.constant 0 : index
    %120 = vector.load %arg2[%c0_113, %c0_114, %c1_115, %c0_116, %c0_117] : memref<1x1x11x9x16xf32, #tpu.memory_space<vmem>>, vector<1x1x8x8x16xf32>
    %121 = vector.shape_cast %120 : vector<1x1x8x8x16xf32> to vector<8x8x16xf32>
    %122 = vector.shape_cast %121 : vector<8x8x16xf32> to vector<64x16xf32>
    %c0_118 = arith.constant 0 : index
    %c0_119 = arith.constant 0 : index
    %123 = vector.load %arg9[%c0_118, %c0_119] : memref<16x128xf32, #tpu.memory_space<vmem>>, vector<16x128xf32>
    %cst_120 = arith.constant dense<0.000000e+00> : vector<64x128xf32>
    %124 = tpu.matmul %122, %123, %cst_120 {dimension_numbers = #tpu.dot_dimension_numbers<[1], [0], [0], [1], [0, 0, 1, 1], [], []>} : vector<64x16xf32>, vector<16x128xf32>, vector<64x128xf32> -> vector<64x128xf32>
    %c0_121 = arith.constant 0 : index
    %c0_122 = arith.constant 0 : index
    %125 = vector.load %arg10[%c0_121, %c0_122] : memref<1x128xf32, #tpu.memory_space<vmem>>, vector<1x128xf32>
    %126 = vector.broadcast %125 : vector<1x128xf32> to vector<64x128xf32>
    %127 = arith.addf %124, %126 : vector<64x128xf32>
    %128 = arith.addf %119, %127 : vector<64x128xf32>
    %129 = vector.shape_cast %128 : vector<64x128xf32> to vector<8x8x128xf32>
    %c0_123 = arith.constant 0 : index
    %c0_124 = arith.constant 0 : index
    %c0_125 = arith.constant 0 : index
    %c0_126 = arith.constant 0 : index
    %130 = vector.load %arg11[%c0_123, %c0_124, %c0_125, %c0_126] : memref<1x8x8x128xf32, #tpu.memory_space<vmem>>, vector<1x8x8x128xf32>
    %131 = vector.shape_cast %130 : vector<1x8x8x128xf32> to vector<8x8x128xf32>
    %132 = vector.shape_cast %129 : vector<8x8x128xf32> to vector<1x8x8x128xf32>
    tpu.vector_store %arg11[%c0_123, %c0_124, %c0_125, %c0_126], %132 {strides = array<i32>} : memref<1x8x8x128xf32, #tpu.memory_space<vmem>>, vector<1x8x8x128xf32>,
    return
  }
  func.func @transform_0(%arg0: i32, %arg1: i32) -> (i32, i32, i32, i32, i32) {
    %c0_i32 = arith.constant 0 : i32
    %c0_i32_0 = arith.constant 0 : i32
    %c0_i32_1 = arith.constant 0 : i32
    %c0_i32_2 = arith.constant 0 : i32
    return %arg0, %arg1, %c0_i32, %c0_i32_0, %c0_i32_1 : i32, i32, i32, i32, i32
  }
  func.func @transform_1(%arg0: i32, %arg1: i32) -> (i32, i32, i32) {
    %c0_i32 = arith.constant 0 : i32
    %c0_i32_0 = arith.constant 0 : i32
    %c0_i32_1 = arith.constant 0 : i32
    %c0_i32_2 = arith.constant 0 : i32
    return %c0_i32, %c0_i32_0, %c0_i32_1 : i32, i32, i32
  }
  func.func @transform_2(%arg0: i32, %arg1: i32) -> (i32, i32) {
    %c0_i32 = arith.constant 0 : i32
    %c0_i32_0 = arith.constant 0 : i32
    %c0_i32_1 = arith.constant 0 : i32
    return %c0_i32, %c0_i32_0 : i32, i32
  }
  func.func @transform_3(%arg0: i32, %arg1: i32) -> (i32, i32, i32) {
    %c0_i32 = arith.constant 0 : i32
    %c0_i32_0 = arith.constant 0 : i32
    %c0_i32_1 = arith.constant 0 : i32
    %c0_i32_2 = arith.constant 0 : i32
    return %c0_i32, %c0_i32_0, %c0_i32_1 : i32, i32, i32
  }
  func.func @transform_4(%arg0: i32, %arg1: i32) -> (i32, i32) {
    %c0_i32 = arith.constant 0 : i32
    %c0_i32_0 = arith.constant 0 : i32
    %c0_i32_1 = arith.constant 0 : i32
    return %c0_i32, %c0_i32_0 : i32, i32
  }
  func.func @transform_5(%arg0: i32, %arg1: i32) -> (i32, i32) {
    %c0_i32 = arith.constant 0 : i32
    %c0_i32_0 = arith.constant 0 : i32
    %c0_i32_1 = arith.constant 0 : i32
    return %c0_i32, %c0_i32_0 : i32, i32
  }
  func.func @transform_6(%arg0: i32, %arg1: i32) -> (i32, i32) {
    %c0_i32 = arith.constant 0 : i32
    %c0_i32_0 = arith.constant 0 : i32
    %c0_i32_1 = arith.constant 0 : i32
    return %c0_i32, %c0_i32_0 : i32, i32
  }
  func.func @transform_7(%arg0: i32, %arg1: i32) -> (i32, i32) {
    %c0_i32 = arith.constant 0 : i32
    %c0_i32_0 = arith.constant 0 : i32
    %c0_i32_1 = arith.constant 0 : i32
    return %c0_i32, %c0_i32_0 : i32, i32
  }
  func.func @transform_8(%arg0: i32, %arg1: i32) -> (i32, i32) {
    %c0_i32 = arith.constant 0 : i32
    %c0_i32_0 = arith.constant 0 : i32
    %c0_i32_1 = arith.constant 0 : i32
    return %c0_i32, %c0_i32_0 : i32, i32
  }
  func.func @transform_9(%arg0: i32, %arg1: i32) -> (i32, i32, i32, i32) {
    %c0_i32 = arith.constant 0 : i32
    %c0_i32_0 = arith.constant 0 : i32
    %c0_i32_1 = arith.constant 0 : i32
    return %arg0, %arg1, %c0_i32, %c0_i32_0 : i32, i32, i32, i32
  }
}

</mosaic_0001>

<bundles_post_ra>
// kernel: residual_block_with_stride.1
= control target key start
LH: loop header
LB: loop body
LE: loop exit
PB: predicated region body
PF: predicated region fallthrough
CT: control target
= control target key end

     0   :  { %s3975_s30 = smov 0   ;;  %s3977_s10 = smov 0   ;;  %s4885_s0 = inlined_call_operand.vmem [shape: f32[2,1,11,9,16], index: 0, kind: input, shape index: {}]   ;;  %s4886_s1 = inlined_call_operand.vmem [shape: f32[4,16,128], index: 1, kind: input, shape index: {}]   ;;  %s4887_s2 = inlined_call_operand.vmem [shape: f32[1,128], index: 2, kind: input, shape index: {}]   ;;  %s4888_s3 = inlined_call_operand.vmem [shape: f32[9,128,128], index: 3, kind: input, shape index: {}]   ;;  %s4889_s4 = inlined_call_operand.vmem [shape: f32[1,128], index: 4, kind: input, shape index: {}]   ;;  %s4890_s5 = inlined_call_operand.vmem [shape: f32[128,128], index: 5, kind: input, shape index: {}]   ;;  %s4891_s6 = inlined_call_operand.vmem [shape: f32[1,128], index: 6, kind: input, shape index: {}]   ;;  %s4892_s7 = inlined_call_operand.vmem [shape: f32[16,128], index: 7, kind: input, shape index: {}]   ;;  %s4893_s8 = inlined_call_operand.vmem [shape: f32[1,128], index: 8, kind: input, shape index: {}]   ;;  %s4894_s9 = inlined_call_operand.vmem [shape: f32[2,8,8,128], index: 9, kind: output, shape index: {}]  }
   0x1   :  { %s3979_s11 = smov 0  }
   0x2 LB: > { %s31_s12 = sadd.s32 1, %s3918_s10  ;;  %p2802_p0 = scmp.ge.s32.totalorder %s3922_s11, 1  ;;  %s3922_s11 = sphi %s3979_s11, %s19_s11   ;;  %s3918_s10 = sphi %s3977_s10, %s4910_s10   ;;  %s3914_s30 = sphi %s3975_s30, %s4909_s30  }
   0x3   : > { %p33_p1 = scmp.ge.s32.totalorder %s31_s12, 2  ;;  %p307_p2 = scmp.lt.s32.totalorder %s3922_s11, 3 }
   0x5   : > { %s4912_s12 = smov (%p33_p1, %s31_s12), 0  ;;  %p308_p3 = pnand %p2802_p0, %p307_p2 }
   0x7   : > { %311 = sbr.rel (%p308_p3) target bundleno = 835 (0x343), region = 56 }
   0xc   : > { %v2807_v0 = vld [vmem:[%s4886_s1 + $0x18] sm:$0xff]  ;;  %v2806_v1 = vld [vmem:[%s4886_s1 + $0x10] sm:$0xff]  ;;  %p351_p4 = scmp.lt.s32.totalorder %s3914_s30, 1  ;;  %v381_v2 = vld [vmem:[%s4886_s1 + $0x8] sm:$0xff]  ;;  %vm395_vm0 = vcmask 130048   ;;  %v3924_v61 = vmov 0.0  }
   0xd   : > { %3853 = vmatprep.subr.mxu1 %v2807_v0  ;;  %3321 = vmatprep.subr.mxu0 %v2807_v0  ;;  %v2839_v3 = vld [vmem:[%s4886_s1 + $0x28] sm:$0xff]  ;;  %v380_v4 = vld [vmem:[%s4886_s1] sm:$0xff]  ;;  %v2861_v15 = vld [vmem:[%s4886_s1 + $0x38] sm:$0xff]  ;;  %1142 = vst [vmem:[#allocation2 + $0x1] sm:$0xff] %v3924_v61 }
   0xe   : > { %3855 = vmatpush3.msra.mxu1 %v2807_v0  ;;  %3322 = vmatpush3.msra.mxu0 %v2807_v0  ;;  %s4914_s30 = smov (!%p351_p4, %s3914_s30), 1  ;;  %v2838_v16 = vld [vmem:[%s4886_s1 + $0x20] sm:$0xff]  ;;  %v2860_v20 = vld [vmem:[%s4886_s1 + $0x30] sm:$0xff]  ;;  %v2888_v30 = vld [vmem:[%s4888_s3 + $0xf8] sm:$0xff]  ;;  %1122 = vst [vmem:[#allocation2] sm:$0x1] %v3924_v61 }
   0xf   : > { %3854 = vmatprep.subr.mxu1 %v2806_v1  ;;  %3323 = vmatprep.subr.mxu0 %v2806_v1  ;;  %s3857_s21 = smul.u32 176, %s4914_s30  ;;  %v2887_v31 = vld [vmem:[%s4888_s3 + $0xf0] sm:$0xff]  ;;  %v2886_v32 = vld [vmem:[%s4888_s3 + $0xe8] sm:$0xff]  ;;  %v2885_v33 = vld [vmem:[%s4888_s3 + $0xe0] sm:$0xff]  ;;  %1123 = vst [vmem:[#allocation2 + $0x10] sm:$0x1] %v3924_v61 }
  0x10   : > { %3856 = vmatpush3.msra.mxu1 %v2806_v1  ;;  %3324 = vmatpush3.msra.mxu0 %v2806_v1  ;;  %v1175_v34 = vld [vmem:[%s4888_s3 + $0x78] sm:$0xff]  ;;  %v1174_v36 = vld [vmem:[%s4888_s3 + $0x70] sm:$0xff]  ;;  %v1173_v38 = vld [vmem:[%s4888_s3 + $0x68] sm:$0xff]  ;;  %1124 = vst [vmem:[#allocation2 + $0x20] sm:$0x1] %v3924_v61  ;;  %s3022_s28 = sshll.u32 %s4914_s30, 6 }
  0x11   : > { %3340 = vmatprep.subr.mxu1 %v381_v2  ;;  %3359 = vmatprep.subr.mxu0 %v2839_v3  ;;  %s4011_s24 = scalar_lea.vmem %s4885_s0, %s3857_s21  ;;  %v2884_v35 = vld [vmem:[%s4888_s3 + $0xd8] sm:$0xff]  ;;  %v2883_v37 = vld [vmem:[%s4888_s3 + $0xd0] sm:$0xff]  ;;  %v2882_v39 = vld [vmem:[%s4888_s3 + $0xc8] sm:$0xff]  ;;  %1125 = vst [vmem:[#allocation2 + $0x30] sm:$0x1] %v3924_v61  ;;  %s4859_s14 = scalar_lea.vmem %s4894_s9, %s3022_s28 }
  0x12   : > { %v382_v5 = vld [vmem:[%s4011_s24 + $0x1] sm:$0xff]  ;;  %v383_v7 = vld [vmem:[%s4011_s24 + $0x11] sm:$0xff]  ;;  %1126 = vst [vmem:[#allocation2 + $0x40] sm:$0x1] %v3924_v61  ;;  %1127 = vst [vmem:[#allocation2 + $0x50] sm:$0x1] %v3924_v61 }
  0x13   : > { %v4018_v6 = vld [vmem:[%s4011_s24 + $0x61] sm:$0xff]  ;;  %3325 = vmatprep.mubr.msk.f32.mxu0 %vm395_vm0, %v382_v5  ;;  %v4025_v8 = vld [vmem:[%s4011_s24 + $0x71] sm:$0xff]  ;;  %1128 = vst [vmem:[#allocation2 + $0x60] sm:$0x1] %v3924_v61  ;;  %1129 = vst [vmem:[#allocation2 + $0x70] sm:$0x1] %v3924_v61 }
  0x14   : > { %3334 = vmatprep.mubr.msk.f32.mxu1 %vm395_vm0, %v4018_v6  ;;  %v384_v9 = vld [vmem:[%s4011_s24 + $0x21] sm:$0xff]  ;;  %3326 = vmatmul.mubr.msk.f32.vlgmr.msra.gmra.mxu0 %vm395_vm0, %v383_v7  ;;  %v385_v11 = vld [vmem:[%s4011_s24 + $0x31] sm:$0xff]  ;;  %1130 = vst [vmem:[#allocation2 + $0x80] sm:$0x1] %v3924_v61  ;;  %1131 = vst [vmem:[#allocation2 + $0x90] sm:$0x1] %v3924_v61 }
  0x15   : > { %v4029_v10 = vld [vmem:[%s4011_s24 + $0x81] sm:$0xff]  ;;  %3335 = vmatmul.mubr.msk.f32.vlgmr.msra.gmra.mxu1 %vm395_vm0, %v4025_v8  ;;  %3328 = vmatprep.mubr.msk.f32.mxu0 %vm395_vm0, %v384_v9  ;;  %v391_v12 = vld [vmem:[%s4011_s24 + $0x91] sm:$0xff]  ;;  %1132 = vst [vmem:[#allocation2 + $0x9] sm:$0x1] %v3924_v61  ;;  %1133 = vst [vmem:[#allocation2 + $0x19] sm:$0x1] %v3924_v61 }
  0x16   : > { %3341 = vmatpush3.msra.mxu1 %v381_v2  ;;  %3337 = vmatprep.mubr.msk.f32.mxu1 %vm395_vm0, %v4029_v10  ;;  %v386_v13 = vld [vmem:[%s4011_s24 + $0x41] sm:$0xff]  ;;  %v387_v17 = vld [vmem:[%s4011_s24 + $0x51] sm:$0xff]  ;;  %1134 = vst [vmem:[#allocation2 + $0x29] sm:$0x1] %v3924_v61  ;;  %1135 = vst [vmem:[#allocation2 + $0x39] sm:$0x1] %v3924_v61 }
  0x17   : > { %3342 = vmatprep.subr.mxu1 %v380_v4  ;;  %v370_v14 = vld [vmem:[%s4011_s24] sm:$0xff]  ;;  %3360 = vmatpush3.msra.mxu0 %v2839_v3  ;;  %v371_v18 = vld [vmem:[%s4011_s24 + $0x10] sm:$0xff]  ;;  %v1171_v42 = vld [vmem:[%s4888_s3 + $0x58] sm:$0xff]  ;;  %1136 = vst [vmem:[#allocation2 + $0x49] sm:$0x1] %v3924_v61 }
  0x18   : > { %3343 = vmatpush3.msra.mxu1 %v380_v4  ;;  %3329 = vmatmul.mubr.msk.f32.gmra.mxu0 %vm395_vm0, %v385_v11  ;;  %v372_v19 = vld [vmem:[%s4011_s24 + $0x20] sm:$0xff]  ;;  %v373_v21 = vld [vmem:[%s4011_s24 + $0x30] sm:$0xff]  ;;  %v2880_v43 = vld [vmem:[%s4888_s3 + $0xb8] sm:$0xff]  ;;  %1137 = vst [vmem:[#allocation2 + $0x59] sm:$0x1] %v3924_v61 }
  0x19   : > { %3338 = vmatmul.mubr.msk.f32.gmra.mxu1 %vm395_vm0, %v391_v12  ;;  %3331 = vmatprep.mubr.msk.f32.mxu0 %vm395_vm0, %v386_v13  ;;  %v374_v22 = vld [vmem:[%s4011_s24 + $0x40] sm:$0xff]  ;;  %v375_v23 = vld [vmem:[%s4011_s24 + $0x50] sm:$0xff]  ;;  %v1169_v46 = vld [vmem:[%s4888_s3 + $0x48] sm:$0xff]  ;;  %1138 = vst [vmem:[#allocation2 + $0x69] sm:$0x1] %v3924_v61 }
  0x1a   : > { %3344 = vmatprep.mubr.msk.f32.mxu1 %vm395_vm0, %v370_v14  ;;  %3378 = vmatprep.subr.mxu1 %v2861_v15  ;;  %v376_v24 = vld [vmem:[%s4011_s24 + $0x60] sm:$0xff]  ;;  %v377_v25 = vld [vmem:[%s4011_s24 + $0x70] sm:$0xff]  ;;  %v2878_v47 = vld [vmem:[%s4888_s3 + $0xa8] sm:$0xff]  ;;  %1139 = vst [vmem:[#allocation2 + $0x79] sm:$0x1] %v3924_v61 }
  0x1b   : > { %3361 = vmatprep.subr.mxu0 %v2838_v16  ;;  %v378_v26 = vld [vmem:[%s4011_s24 + $0x80] sm:$0xff]  ;;  %v379_v27 = vld [vmem:[%s4011_s24 + $0x90] sm:$0xff]  ;;  %v1167_v50 = vld [vmem:[%s4888_s3 + $0x38] sm:$0xff]  ;;  %1140 = vst [vmem:[#allocation2 + $0x89] sm:$0x1] %v3924_v61 }
  0x1c   : > { %3362 = vmatpush3.msra.mxu0 %v2838_v16  ;;  %v2837_v28 = vld [vmem:[%s4011_s24 + $0xa0] sm:$0xff]  ;;  %v1170_v44 = vld [vmem:[%s4888_s3 + $0x50] sm:$0xff]  ;;  %v2876_v51 = vld [vmem:[%s4888_s3 + $0x98] sm:$0xff]  ;;  %1141 = vst [vmem:[#allocation2 + $0x99] sm:$0x1] %v3924_v61 }
  0x1d   : > { %3332 = vmatmul.mubr.msk.f32.gmra.mxu0 %vm395_vm0, %v387_v17  ;;  %3345 = vmatmul.mubr.msk.f32.vlgmr.msra.gmra.mxu1 %vm395_vm0, %v371_v18  ;;  %v2859_v29 = vld [vmem:[%s4011_s24 + $0xa1] sm:$0xff]  ;;  %v2879_v45 = vld [vmem:[%s4888_s3 + $0xb0] sm:$0xff]  ;;  %v1163_v58 = vld [vmem:[%s4888_s3 + $0x18] sm:$0xff]  ;;  %1151 = vst [vmem:[#allocation2 + $0x91] sm:$0xff] %v3924_v61 }
  0x1e   : > { %3379 = vmatpush3.msra.mxu1 %v2861_v15  ;;  %3347 = vmatprep.mubr.msk.f32.mxu1 %vm395_vm0, %v372_v19  ;;  %v1172_v40 = vld [vmem:[%s4888_s3 + $0x60] sm:$0xff]  ;;  %v1166_v52 = vld [vmem:[%s4888_s3 + $0x30] sm:$0xff]  ;;  %v1165_v54 = vld [vmem:[%s4888_s3 + $0x28] sm:$0xff] }
  0x1f   : > { %3363 = vmatprep.mubr.msk.f32.mxu0 %vm395_vm0, %v371_v18  ;;  %3380 = vmatprep.subr.mxu1 %v2860_v20  ;;  %v2881_v41 = vld [vmem:[%s4888_s3 + $0xc0] sm:$0xff]  ;;  %v2875_v53 = vld [vmem:[%s4888_s3 + $0x90] sm:$0xff]  ;;  %v2874_v55 = vld [vmem:[%s4888_s3 + $0x88] sm:$0xff] }
  0x20   : > { %3381 = vmatpush3.msra.mxu1 %v2860_v20  ;;  %3397 = vmatprep.subr.mxu0 %v2888_v30  ;;  %v1168_v48 = vld [vmem:[%s4888_s3 + $0x40] sm:$0xff]  ;;  %v4189_v59 = vld [vmem:[%s4888_s3 + $0x178] sm:$0xff]  ;;  %v1162_v60 = vld [vmem:[%s4888_s3 + $0x10] sm:$0xff] }
  0x21   : > { %3348 = vmatmul.mubr.msk.f32.gmra.mxu1 %vm395_vm0, %v373_v21  ;;  %3364 = vmatmul.mubr.msk.f32.vlgmr.msra.gmra.mxu0 %vm395_vm0, %v372_v19  ;;  %v2877_v49 = vld [vmem:[%s4888_s3 + $0xa0] sm:$0xff]  ;;  %v1161_v62 = vld [vmem:[%s4888_s3 + $0x8] sm:$0xff]  ;;  %v4204_v1 = vld [vmem:[%s4888_s3 + $0x1f8] sm:$0xff] }
  0x22   : > { %3350 = vmatprep.mubr.msk.f32.mxu1 %vm395_vm0, %v374_v22  ;;  %3366 = vmatprep.mubr.msk.f32.mxu0 %vm395_vm0, %v373_v21  ;;  %v1164_v56 = vld [vmem:[%s4888_s3 + $0x20] sm:$0xff] }
  0x23   : > { %3398 = vmatpush3.msra.mxu0 %v2888_v30  ;;  %3441 = vmatprep.subr.mxu1 %v1175_v34  ;;  %v2873_v57 = vld [vmem:[%s4888_s3 + $0x80] sm:$0xff] }
  0x24   : > { %3399 = vmatprep.subr.mxu0 %v2887_v31  ;;  %v1160_v63 = vld [vmem:[%s4888_s3] sm:$0xff] }
  0x25   : > { %3351 = vmatmul.mubr.msk.f32.gmra.mxu1 %vm395_vm0, %v375_v23  ;;  %3367 = vmatmul.mubr.msk.f32.gmra.mxu0 %vm395_vm0, %v374_v22  ;;  %v1152_v0 = vld [vmem:[#allocation2] sm:$0xff] }
  0x26   : > { %3353 = vmatprep.mubr.msk.f32.mxu1 %vm395_vm0, %v376_v24  ;;  %3369 = vmatprep.mubr.msk.f32.mxu0 %vm395_vm0, %v375_v23 }
  0x27   : > { %3400 = vmatpush3.msra.mxu0 %v2887_v31 }
  0x28   : > { %3401 = vmatprep.subr.mxu0 %v2886_v32 }
  0x29   : > { %3354 = vmatmul.mubr.msk.f32.gmra.mxu1 %vm395_vm0, %v377_v25  ;;  %3370 = vmatmul.mubr.msk.f32.gmra.mxu0 %vm395_vm0, %v376_v24 }
  0x2a   : > { %3356 = vmatprep.mubr.msk.f32.mxu1 %vm395_vm0, %v378_v26  ;;  %3372 = vmatprep.mubr.msk.f32.mxu0 %vm395_vm0, %v377_v25 }
  0x2b   : > { %3402 = vmatpush3.msra.mxu0 %v2886_v32 }
  0x2c   : > { %3403 = vmatprep.subr.mxu0 %v2885_v33 }
  0x2d   : > { %3357 = vmatmul.mubr.msk.f32.gmra.mxu1 %vm395_vm0, %v379_v27  ;;  %3373 = vmatmul.mubr.msk.f32.gmra.mxu0 %vm395_vm0, %v378_v26 }
  0x2e   : > { %3375 = vmatprep.mubr.msk.f32.mxu0 %vm395_vm0, %v379_v27  ;;  %3382 = vmatprep.mubr.msk.f32.mxu1 %vm395_vm0, %v383_v7 }
  0x2f   : > { %3404 = vmatpush3.msra.mxu0 %v2885_v33 }
  0x30   : > { %3405 = vmatprep.subr.mxu0 %v2884_v35 }
  0x31   : > { %3376 = vmatmul.mubr.msk.f32.gmra.mxu0 %vm395_vm0, %v2837_v28  ;;  %3383 = vmatmul.mubr.msk.f32.vlgmr.msra.gmra.mxu1 %vm395_vm0, %v384_v9 }
  0x32   : > { %3385 = vmatprep.mubr.msk.f32.mxu1 %vm395_vm0, %v385_v11  ;;  %3442 = vmatpush3.msra.mxu1 %v1175_v34  ;;  %v4214_v34 = vld [vmem:[%s4887_s2] ss:$0 sm:$0xff] }
  0x33   : > { %3406 = vmatpush3.msra.mxu0 %v2884_v35  ;;  %3443 = vmatprep.subr.mxu1 %v1174_v36 }
  0x34   : > { %3407 = vmatprep.subr.mxu0 %v2883_v37  ;;  %3444 = vmatpush3.msra.mxu1 %v1174_v36 }
  0x35   : > { %3386 = vmatmul.mubr.msk.f32.gmra.mxu1 %vm395_vm0, %v386_v13  ;;  %3408 = vmatpush3.msra.mxu0 %v2883_v37 }
  0x36   : > { %3388 = vmatprep.mubr.msk.f32.mxu1 %vm395_vm0, %v387_v17  ;;  %3445 = vmatprep.subr.mxu1 %v1173_v38 }
  0x37   : > { %3409 = vmatprep.subr.mxu0 %v2882_v39  ;;  %3446 = vmatpush3.msra.mxu1 %v1173_v38 }
  0x38   : > { %3410 = vmatpush3.msra.mxu0 %v2882_v39  ;;  %3447 = vmatprep.subr.mxu1 %v1172_v40 }
  0x39   : > { %3389 = vmatmul.mubr.msk.f32.gmra.mxu1 %vm395_vm0, %v4018_v6  ;;  %3411 = vmatprep.subr.mxu0 %v2881_v41 }
  0x3a   : > { %3391 = vmatprep.mubr.msk.f32.mxu1 %vm395_vm0, %v4025_v8  ;;  %3448 = vmatpush3.msra.mxu1 %v1172_v40 }
  0x3b   : > { %3412 = vmatpush3.msra.mxu0 %v2881_v41  ;;  %3449 = vmatprep.subr.mxu1 %v1171_v42 }
  0x3c   : > { %3413 = vmatprep.subr.mxu0 %v2880_v43  ;;  %3450 = vmatpush3.msra.mxu1 %v1171_v42 }
  0x3d   : > { %3392 = vmatmul.mubr.msk.f32.gmra.mxu1 %vm395_vm0, %v4029_v10  ;;  %3414 = vmatpush3.msra.mxu0 %v2880_v43 }
  0x3e   : > { %3394 = vmatprep.mubr.msk.f32.mxu1 %vm395_vm0, %v391_v12  ;;  %3451 = vmatprep.subr.mxu1 %v1170_v44 }
  0x3f   : > { %3415 = vmatprep.subr.mxu0 %v2879_v45  ;;  %3452 = vmatpush3.msra.mxu1 %v1170_v44 }
  0x40   : > { %3416 = vmatpush3.msra.mxu0 %v2879_v45  ;;  %3453 = vmatprep.subr.mxu1 %v1169_v46 }
  0x41   : > { %3395 = vmatmul.mubr.msk.f32.gmra.mxu1 %vm395_vm0, %v2859_v29  ;;  %3417 = vmatprep.subr.mxu0 %v2878_v47 }
  0x42   : > { %3454 = vmatpush3.msra.mxu1 %v1169_v46  ;;  %3418 = vmatpush3.msra.mxu0 %v2878_v47 }
  0x43   : > { %3455 = vmatprep.subr.mxu1 %v1168_v48  ;;  %3419 = vmatprep.subr.mxu0 %v2877_v49 }
  0x44   : > { %3456 = vmatpush3.msra.mxu1 %v1168_v48  ;;  %3420 = vmatpush3.msra.mxu0 %v2877_v49 }
  0x45   : > { %3457 = vmatprep.subr.mxu1 %v1167_v50  ;;  %3421 = vmatprep.subr.mxu0 %v2876_v51 }
  0x46   : > { %3458 = vmatpush3.msra.mxu1 %v1167_v50  ;;  %3422 = vmatpush3.msra.mxu0 %v2876_v51  ;;  %v2903_v51 = vld [vmem:[%s4888_s3 + $0x170] sm:$0xff] }
  0x47   : > { %3459 = vmatprep.subr.mxu1 %v1166_v52  ;;  %3423 = vmatprep.subr.mxu0 %v2875_v53 }
  0x48   : > { %3460 = vmatpush3.msra.mxu1 %v1166_v52  ;;  %3424 = vmatpush3.msra.mxu0 %v2875_v53 }
  0x49   : > { %3461 = vmatprep.subr.mxu1 %v1165_v54  ;;  %3425 = vmatprep.subr.mxu0 %v2874_v55 }
  0x4a   : > { %3462 = vmatpush3.msra.mxu1 %v1165_v54  ;;  %3426 = vmatpush3.msra.mxu0 %v2874_v55 }
  0x4b   : > { %3463 = vmatprep.subr.mxu1 %v1164_v56  ;;  %3427 = vmatprep.subr.mxu0 %v2873_v57 }
  0x4c   : > { %3464 = vmatpush3.msra.mxu1 %v1164_v56  ;;  %3428 = vmatpush3.msra.mxu0 %v2873_v57 }
  0x4d   : > { %3465 = vmatprep.subr.mxu1 %v1163_v58  ;;  %3429 = vmatprep.mubr.f32.mxu0 %v3924_v61 }
  0x4e   : > { %3466 = vmatpush3.msra.mxu1 %v1163_v58  ;;  %3485 = vmatprep.subr.mxu0 %v4189_v59  ;;  %v2902_v58 = vld [vmem:[%s4888_s3 + $0x168] sm:$0xff] }
  0x4f   : > { %3467 = vmatprep.subr.mxu1 %v1162_v60  ;;  %3473 = vmatprep.mubr.f32.mxu1 %v1152_v0 }
  0x50   : > { %3468 = vmatpush3.msra.mxu1 %v1162_v60 }
  0x51   : > { %3469 = vmatprep.subr.mxu1 %v1161_v62 }
  0x52   : > { %3470 = vmatpush3.msra.mxu1 %v1161_v62 }
  0x53   : > { %3471 = vmatprep.subr.mxu1 %v1160_v63 }
  0x54   : > { %3472 = vmatpush3.msra.mxu1 %v1160_v63 }
  0x55   : > { %3529 = vmatprep.subr.mxu1 %v4204_v1 }
  0xd4   : > { %v3327_v2 = vpop.f32.mrf.mxu0 }
  0xd5   : > { %v3336_v3 = vpop.f32.mrf.mxu1 }
  0xd6   : > { %v492_v4 = vpop.f32.mrf.mxu0 }
  0xd7   : > { %v522_v5 = vpop.f32.mrf.mxu1 }
  0xd8   : > { %v3330_v6 = vpop.f32.mrf.mxu0 }
  0xd9   : > { %v3339_v7 = vpop.f32.mrf.mxu1 }
  0xda   : > { %v502_v8 = vpop.f32.mrf.mxu0 }
  0xdb   : > { %v4207_v9 = vpop.f32.mrf.mxu1 }
  0xdd   : > { %v3333_v10 = vpop.f32.mrf.mxu0  ;;  %v3346_v11 = vpop.f32.mrf.mxu1 }
  0xde   : > { %v643_v28 = vadd.f32 %v3346_v11, %v3327_v2 }
  0xdf   : > { %v512_v12 = vpop.f32.mrf.mxu0  ;;  %v637_v13 = vpop.f32.mrf.mxu1 }
  0xe1   : > { %v3349_v14 = vpop.f32.mrf.mxu1  ;;  %v3365_v15 = vpop.f32.mrf.mxu0 }
  0xe2   : > { %v846_v31 = vadd.f32 %v3365_v15, %v643_v28  ;;  %v653_v35 = vadd.f32 %v3349_v14, %v3330_v6  ;;  %v2900_v14 = vld [vmem:[%s4888_s3 + $0x158] sm:$0xff] }
  0xe3   : > { %v647_v16 = vpop.f32.mrf.mxu1  ;;  %v796_v17 = vpop.f32.mrf.mxu0 }
  0xe4   : > { %v648_v38 = vadd.f32 %v647_v16, %v502_v8 }
  0xe5   : > { %v3352_v18 = vpop.f32.mrf.mxu1  ;;  %v3368_v19 = vpop.f32.mrf.mxu0 }
  0xe6   : > { %v848_v39 = vadd.f32 %v3368_v19, %v653_v35  ;;  %v663_v41 = vadd.f32 %v3352_v18, %v3333_v10 }
  0xe7   : > { %v657_v20 = vpop.f32.mrf.mxu1  ;;  %v806_v21 = vpop.f32.mrf.mxu0 }
  0xe8   : > { %v847_v43 = vadd.f32 %v806_v21, %v648_v38  ;;  %v658_v52 = vadd.f32 %v657_v20, %v512_v12  ;;  %v2919_v20 = vld [vmem:[%s4888_s3 + $0x1f0] sm:$0xff] }
  0xe9   : > { %v3355_v22 = vpop.f32.mrf.mxu1  ;;  %v3371_v23 = vpop.f32.mrf.mxu0 }
  0xea   : > { %v850_v47 = vadd.f32 %v3371_v23, %v663_v41  ;;  %v673_v53 = vadd.f32 %v3355_v22, %v3336_v3  ;;  %v2914_v41 = vld [vmem:[%s4888_s3 + $0x1c8] sm:$0xff] }
  0xeb   : > { %v667_v24 = vpop.f32.mrf.mxu1  ;;  %v816_v25 = vpop.f32.mrf.mxu0 }
  0xec   : > { %v668_v60 = vadd.f32 %v667_v24, %v522_v5  ;;  %v849_v61 = vadd.f32 %v816_v25, %v658_v52  ;;  %v2911_v52 = vld [vmem:[%s4888_s3 + $0x1b0] sm:$0xff] }
  0xed   : > { %v3358_v26 = vpop.f32.mrf.mxu1  ;;  %v3374_v27 = vpop.f32.mrf.mxu0 }
  0xee   : > { %v852_v62 = vadd.f32 %v3374_v27, %v673_v53  ;;  %v2918_v26 = vld [vmem:[%s4888_s3 + $0x1e8] sm:$0xff] }
  0xef   : > { %v4209_v29 = vpop.f32.mrf.mxu1  ;;  %v826_v30 = vpop.f32.mrf.mxu0  ;;  %v2894_v53 = vld [vmem:[%s4888_s3 + $0x128] sm:$0xff] }
  0xf0   : > { %v851_v4 = vadd.f32 %v826_v30, %v668_v60  ;;  %v678_v15 = vadd.f32 %v4209_v29, %v4207_v9  ;;  %v2899_v9 = vld [vmem:[%s4888_s3 + $0x150] sm:$0xff] }
  0xf1   : > { %v3377_v32 = vpop.f32.mrf.mxu0  ;;  %v3384_v33 = vpop.f32.mrf.mxu1  ;;  %v2891_v60 = vld [vmem:[%s4888_s3 + $0x110] sm:$0xff] }
  0xf2   : > { %v1014_v36 = vadd.f32 %v3384_v33, %v846_v31 }
  0xf3   : > { %v964_v37 = vpop.f32.mrf.mxu1  ;;  %v836_v11 = vpop.f32.mrf.mxu0 }
  0xf4   : > { %v1031_v40 = vadd.f32 %v4214_v34, %v1014_v36  ;;  %v853_v23 = vadd.f32 %v836_v11, %v678_v15  ;;  %v2916_v36 = vld [vmem:[%s4888_s3 + $0x1d8] sm:$0xff]  ;;  %v2898_v37 = vld [vmem:[%s4888_s3 + $0x148] sm:$0xff]  ;;  %v2951_v11 = vld [vmem:[%s4888_s3 + $0x2f0] sm:$0xff] }
  0xf5   : > { %v3387_v42 = vpop.f32.mrf.mxu1 }
  0xf6   : > { %vm1041_vm1 = vcmp.ge.f32.partialorder %v1031_v40, 0.0  ;;  %v1051_v44 = vmul.f32 0.01, %v1031_v40  ;;  %v1016_v45 = vadd.f32 %v3387_v42, %v848_v39  ;;  %v2915_v39 = vld [vmem:[%s4888_s3 + $0x1d0] sm:$0xff] }
  0xf7   : > { %v974_v46 = vpop.f32.mrf.mxu1 }
  0xf8   : > { %v4217_v48 = vsel %vm1041_vm1, %v1031_v40, %v1051_v44  ;;  %v1033_v49 = vadd.f32 %v4214_v34, %v1016_v45  ;;  %v1015_v50 = vadd.f32 %v974_v46, %v847_v43  ;;  %v2897_v43 = vld [vmem:[%s4888_s3 + $0x140] sm:$0xff] }
  0xf9   : > { %1143 = vst [vmem:[#allocation2 + $0x11] sm:$0xff] %v4217_v48  ;;  %v3390_v54 = vpop.f32.mrf.mxu1  ;;  %3430 = vmatmul.mubr.f32.vlgmr.msra.gmra.mxu0 %v4217_v48  ;;  %v2913_v45 = vld [vmem:[%s4888_s3 + $0x1c0] sm:$0xff] }
  0xfa   : > { %vm1043_vm2 = vcmp.ge.f32.partialorder %v1033_v49, 0.0  ;;  %v1053_v55 = vmul.f32 0.01, %v1033_v49  ;;  %v1032_v56 = vadd.f32 %v4214_v34, %v1015_v50  ;;  %v1018_v57 = vadd.f32 %v3390_v54, %v850_v47  ;;  %3486 = vmatpush3.msra.mxu0 %v4189_v59  ;;  %v2901_v59 = vld [vmem:[%s4888_s3 + $0x160] sm:$0xff]  ;;  %v2896_v47 = vld [vmem:[%s4888_s3 + $0x138] sm:$0xff]  ;;  %v2910_v54 = vld [vmem:[%s4888_s3 + $0x1a8] sm:$0xff] }
  0xfb   : > { %v984_v63 = vpop.f32.mrf.mxu1  ;;  %3487 = vmatprep.subr.mxu0 %v2903_v51 }
  0xfc   : > { %v4230_v0 = vsel %vm1043_vm2, %v1033_v49, %v1053_v55  ;;  %vm1042_vm3 = vcmp.ge.f32.partialorder %v1032_v56, 0.0  ;;  %v1052_v2 = vmul.f32 0.01, %v1032_v56  ;;  %v1035_v3 = vadd.f32 %v4214_v34, %v1018_v57  ;;  %3488 = vmatpush3.msra.mxu0 %v2903_v51  ;;  %v2912_v49 = vld [vmem:[%s4888_s3 + $0x1b8] sm:$0xff]  ;;  %v2895_v51 = vld [vmem:[%s4888_s3 + $0x130] sm:$0xff]  ;;  %v2893_v55 = vld [vmem:[%s4888_s3 + $0x120] sm:$0xff] }
  0xfd   : > { %1145 = vst [vmem:[#allocation2 + $0x31] sm:$0xff] %v4230_v0  ;;  %v1017_v6 = vadd.f32 %v984_v63, %v849_v61  ;;  %v3393_v5 = vpop.f32.mrf.mxu1  ;;  %3489 = vmatprep.subr.mxu0 %v2902_v58  ;;  %v2892_v57 = vld [vmem:[%s4888_s3 + $0x118] sm:$0xff]  ;;  %v2907_v61 = vld [vmem:[%s4888_s3 + $0x190] sm:$0xff]  ;;  %v2906_v63 = vld [vmem:[%s4888_s3 + $0x188] sm:$0xff] }
  0xfe   : > { %v4237_v7 = vsel %vm1042_vm3, %v1032_v56, %v1052_v2  ;;  %vm1045_vm4 = vcmp.ge.f32.partialorder %v1035_v3, 0.0  ;;  %v1055_v8 = vmul.f32 0.01, %v1035_v3  ;;  %v1020_v10 = vadd.f32 %v3393_v5, %v852_v62  ;;  %3490 = vmatpush3.msra.mxu0 %v2902_v58  ;;  %v2909_v56 = vld [vmem:[%s4888_s3 + $0x1a0] sm:$0xff]  ;;  %v2908_v58 = vld [vmem:[%s4888_s3 + $0x198] sm:$0xff]  ;;  %v2890_v62 = vld [vmem:[%s4888_s3 + $0x108] sm:$0xff] }
  0xff   : > { %1144 = vst [vmem:[#allocation2 + $0x21] sm:$0xff] %v4237_v7  ;;  %v1034_v12 = vadd.f32 %v4214_v34, %v1017_v6  ;;  %v994_v13 = vpop.f32.mrf.mxu1  ;;  %3491 = vmatprep.subr.mxu0 %v2901_v59  ;;  %3432 = vmatprep.mubr.f32.mxu0 %v4237_v7  ;;  %v2889_v2 = vld [vmem:[%s4888_s3 + $0x100] sm:$0xff]  ;;  %v2952_v5 = vld [vmem:[%s4888_s3 + $0x2f8] sm:$0xff] }
 0x100   : > { %v4247_v16 = vsel %vm1045_vm4, %v1035_v3, %v1055_v8  ;;  %v1037_v17 = vadd.f32 %v4214_v34, %v1020_v10  ;;  %v1019_v18 = vadd.f32 %v994_v13, %v851_v4  ;;  %v4250_v19 = vld [vmem:[#allocation2 + $0x10] sm:$0xff]  ;;  %3492 = vmatpush3.msra.mxu0 %v2901_v59  ;;  %v2905_v3 = vld [vmem:[%s4888_s3 + $0x180] sm:$0xff]  ;;  %v2936_v4 = vld [vmem:[%s4888_s3 + $0x278] sm:$0xff] }
 0x101   : > { %1147 = vst [vmem:[#allocation2 + $0x51] sm:$0xff] %v4247_v16  ;;  %vm1044_vm5 = vcmp.ge.f32.partialorder %v1034_v12, 0.0  ;;  %v1054_v21 = vmul.f32 0.01, %v1034_v12  ;;  %v3396_v22 = vpop.f32.mrf.mxu1  ;;  %3474 = vmatmul.mubr.f32.vlgmr.msra.gmra.mxu1 %v4250_v19  ;;  %3433 = vmatmul.mubr.f32.gmra.mxu0 %v4230_v0  ;;  %v1411_v59 = vld [vmem:[#allocation2 + $0x2] sm:$0xff]  ;;  %v4374_v6 = vld [vmem:[#allocation2 + $0x12] sm:$0xff] }
 0x102   : > { %vm1047_vm6 = vcmp.ge.f32.partialorder %v1037_v17, 0.0  ;;  %v1057_v24 = vmul.f32 0.01, %v1037_v17  ;;  %v1036_v25 = vadd.f32 %v4214_v34, %v1019_v18  ;;  %3530 = vmatpush3.msra.mxu1 %v4204_v1  ;;  %3493 = vmatprep.subr.mxu0 %v2900_v14  ;;  %v2917_v1 = vld [vmem:[%s4888_s3 + $0x1e0] sm:$0xff]  ;;  %v2935_v10 = vld [vmem:[%s4888_s3 + $0x270] sm:$0xff] }
 0x103   : > { %v4266_v27 = vsel %vm1044_vm5, %v1034_v12, %v1054_v21  ;;  %3531 = vmatprep.subr.mxu1 %v2919_v20  ;;  %v1004_v28 = vpop.f32.mrf.mxu1  ;;  %3494 = vmatpush3.msra.mxu0 %v2900_v14  ;;  %v2934_v12 = vld [vmem:[%s4888_s3 + $0x268] sm:$0xff]  ;;  %v2949_v18 = vld [vmem:[%s4888_s3 + $0x2e0] sm:$0xff]  ;;  %v2948_v21 = vld [vmem:[%s4888_s3 + $0x2d8] sm:$0xff] }
 0x104   : > { %1146 = vst [vmem:[#allocation2 + $0x41] sm:$0xff] %v4266_v27  ;;  %v4269_v29 = vsel %vm1047_vm6, %v1037_v17, %v1057_v24  ;;  %vm1046_vm7 = vcmp.ge.f32.partialorder %v1036_v25, 0.0  ;;  %v1056_v30 = vmul.f32 0.01, %v1036_v25  ;;  %v1021_v31 = vadd.f32 %v1004_v28, %v853_v23  ;;  %3532 = vmatpush3.msra.mxu1 %v2919_v20  ;;  %3495 = vmatprep.subr.mxu0 %v2899_v9  ;;  %v4394_v13 = vld [vmem:[#allocation2 + $0x32] sm:$0xff]  ;;  %v2950_v14 = vld [vmem:[%s4888_s3 + $0x2e8] sm:$0xff] }
 0x105   : > { %1149 = vst [vmem:[#allocation2 + $0x71] sm:$0xff] %v4269_v29  ;;  %3533 = vmatprep.subr.mxu1 %v2918_v26  ;;  %3435 = vmatprep.mubr.f32.mxu0 %v4266_v27  ;;  %v2933_v17 = vld [vmem:[%s4888_s3 + $0x260] sm:$0xff]  ;;  %v2947_v23 = vld [vmem:[%s4888_s3 + $0x2d0] sm:$0xff]  ;;  %v2930_v24 = vld [vmem:[%s4888_s3 + $0x248] sm:$0xff] }
 0x106   : > { %v4276_v32 = vsel %vm1046_vm7, %v1036_v25, %v1056_v30  ;;  %v1038_v33 = vadd.f32 %v4214_v34, %v1021_v31  ;;  %3534 = vmatpush3.msra.mxu1 %v2918_v26  ;;  %v4279_v35 = vld [vmem:[#allocation2 + $0x20] sm:$0xff]  ;;  %3496 = vmatpush3.msra.mxu0 %v2899_v9  ;;  %v4289_v34 = vld [vmem:[#allocation2 + $0x30] sm:$0xff]  ;;  %v2946_v26 = vld [vmem:[%s4888_s3 + $0x2c8] sm:$0xff] }
 0x107   : > { %1148 = vst [vmem:[#allocation2 + $0x61] sm:$0xff] %v4276_v32  ;;  %3535 = vmatprep.subr.mxu1 %v2917_v1  ;;  %3476 = vmatprep.mubr.f32.mxu1 %v4279_v35  ;;  %v4381_v8 = vld [vmem:[#allocation2 + $0x22] sm:$0xff]  ;;  %v2931_v9 = vld [vmem:[%s4888_s3 + $0x250] sm:$0xff] }
 0x108   : > { %vm1048_vm8 = vcmp.ge.f32.partialorder %v1038_v33, 0.0  ;;  %v1058_v38 = vmul.f32 0.01, %v1038_v33  ;;  %3536 = vmatpush3.msra.mxu1 %v2917_v1  ;;  %3436 = vmatmul.mubr.f32.gmra.mxu0 %v4247_v16  ;;  %v4308_v44 = vld [vmem:[#allocation2 + $0x50] sm:$0xff]  ;;  %v2929_v30 = vld [vmem:[%s4888_s3 + $0x240] sm:$0xff]  ;;  %v2928_v1 = vld [vmem:[%s4888_s3 + $0x238] sm:$0xff] }
 0x109   : > { %3477 = vmatmul.mubr.f32.gmra.mxu1 %v4289_v34  ;;  %3537 = vmatprep.subr.mxu1 %v2916_v36  ;;  %v4414_v20 = vld [vmem:[#allocation2 + $0x52] sm:$0xff]  ;;  %v2945_v31 = vld [vmem:[%s4888_s3 + $0x2c0] sm:$0xff] }
 0x10a   : > { %v4296_v40 = vsel %vm1048_vm8, %v1038_v33, %v1058_v38  ;;  %3538 = vmatpush3.msra.mxu1 %v2916_v36  ;;  %3497 = vmatprep.subr.mxu0 %v2898_v37  ;;  %v2944_v33 = vld [vmem:[%s4888_s3 + $0x2b8] sm:$0xff]  ;;  %v2927_v36 = vld [vmem:[%s4888_s3 + $0x230] sm:$0xff]  ;;  %v2942_v38 = vld [vmem:[%s4888_s3 + $0x2a8] sm:$0xff] }
 0x10b   : > { %1150 = vst [vmem:[#allocation2 + $0x81] sm:$0xff] %v4296_v40  ;;  %3539 = vmatprep.subr.mxu1 %v2915_v39  ;;  %v4302_v42 = vld [vmem:[#allocation2 + $0x40] sm:$0xff]  ;;  %3498 = vmatpush3.msra.mxu0 %v2898_v37  ;;  %v2926_v37 = vld [vmem:[%s4888_s3 + $0x228] sm:$0xff] }
 0x10c   : > { %3479 = vmatprep.mubr.f32.mxu1 %v4302_v42  ;;  %3540 = vmatpush3.msra.mxu1 %v2915_v39  ;;  %v4325_v50 = vld [vmem:[#allocation2 + $0x70] sm:$0xff]  ;;  %v4401_v15 = vld [vmem:[#allocation2 + $0x42] sm:$0xff] }
 0x10d   : > { %3480 = vmatmul.mubr.f32.gmra.mxu1 %v4308_v44  ;;  %3541 = vmatprep.subr.mxu1 %v2914_v41  ;;  %v4434_v25 = vld [vmem:[#allocation2 + $0x72] sm:$0xff]  ;;  %v2925_v39 = vld [vmem:[%s4888_s3 + $0x220] sm:$0xff] }
 0x10e   : > { %3542 = vmatpush3.msra.mxu1 %v2914_v41  ;;  %3499 = vmatprep.subr.mxu0 %v2897_v43  ;;  %v4314_v46 = vld [vmem:[#allocation2 + $0x60] sm:$0xff] }
 0x10f   : > { %3543 = vmatprep.subr.mxu1 %v2913_v45  ;;  %3438 = vmatprep.mubr.f32.mxu0 %v4276_v32  ;;  %v4421_v22 = vld [vmem:[#allocation2 + $0x62] sm:$0xff] }
 0x110   : > { %3482 = vmatprep.mubr.f32.mxu1 %v4314_v46  ;;  %3500 = vmatpush3.msra.mxu0 %v2897_v43  ;;  %v2941_v41 = vld [vmem:[%s4888_s3 + $0x2a0] sm:$0xff]  ;;  %v2924_v43 = vld [vmem:[%s4888_s3 + $0x218] sm:$0xff] }
 0x111   : > { %3544 = vmatpush3.msra.mxu1 %v2913_v45  ;;  %3439 = vmatmul.mubr.f32.gmra.mxu0 %v4269_v29  ;;  %v2940_v45 = vld [vmem:[%s4888_s3 + $0x298] sm:$0xff] }
 0x112   : > { %3483 = vmatmul.mubr.f32.gmra.mxu1 %v4325_v50  ;;  %3501 = vmatprep.subr.mxu0 %v2896_v47  ;;  %v4440_v28 = vld [vmem:[#allocation2 + $0x80] sm:$0xff] }
 0x113   : > { %3545 = vmatprep.subr.mxu1 %v2912_v49  ;;  %3502 = vmatpush3.msra.mxu0 %v2896_v47  ;;  %v2923_v47 = vld [vmem:[%s4888_s3 + $0x210] sm:$0xff] }
 0x114   : > { %3546 = vmatpush3.msra.mxu1 %v2912_v49  ;;  %3561 = vmatprep.mubr.f32.mxu1 %v4250_v19  ;;  %v2932_v19 = vld [vmem:[%s4888_s3 + $0x258] sm:$0xff]  ;;  %v2939_v49 = vld [vmem:[%s4888_s3 + $0x290] sm:$0xff] }
 0x115   : > { %3503 = vmatprep.subr.mxu0 %v2895_v51  ;;  %3547 = vmatprep.subr.mxu1 %v2911_v52 }
 0x116   : > { %3504 = vmatpush3.msra.mxu0 %v2895_v51  ;;  %3548 = vmatpush3.msra.mxu1 %v2911_v52  ;;  %v2922_v51 = vld [vmem:[%s4888_s3 + $0x208] sm:$0xff] }
 0x117   : > { %3505 = vmatprep.subr.mxu0 %v2894_v53  ;;  %3549 = vmatprep.subr.mxu1 %v2910_v54  ;;  %v2938_v52 = vld [vmem:[%s4888_s3 + $0x288] sm:$0xff] }
 0x118   : > { %3506 = vmatpush3.msra.mxu0 %v2894_v53  ;;  %3550 = vmatpush3.msra.mxu1 %v2910_v54  ;;  %v2921_v53 = vld [vmem:[%s4888_s3 + $0x200] sm:$0xff] }
 0x119   : > { %3507 = vmatprep.subr.mxu0 %v2893_v55  ;;  %3551 = vmatprep.subr.mxu1 %v2909_v56  ;;  %v2937_v54 = vld [vmem:[%s4888_s3 + $0x280] sm:$0xff] }
 0x11a   : > { %3508 = vmatpush3.msra.mxu0 %v2893_v55  ;;  %3552 = vmatpush3.msra.mxu1 %v2909_v56  ;;  %v2968_v55 = vld [vmem:[%s4888_s3 + $0x378] sm:$0xff] }
 0x11b   : > { %3509 = vmatprep.subr.mxu0 %v2892_v57  ;;  %3553 = vmatprep.subr.mxu1 %v2908_v58  ;;  %v2984_v56 = vld [vmem:[%s4888_s3 + $0x3f8] sm:$0xff] }
 0x11c   : > { %3510 = vmatpush3.msra.mxu0 %v2892_v57  ;;  %3554 = vmatpush3.msra.mxu1 %v2908_v58  ;;  %v2967_v57 = vld [vmem:[%s4888_s3 + $0x370] sm:$0xff] }
 0x11d   : > { %3511 = vmatprep.subr.mxu0 %v2891_v60  ;;  %3555 = vmatprep.subr.mxu1 %v2907_v61  ;;  %v2983_v58 = vld [vmem:[%s4888_s3 + $0x3f0] sm:$0xff] }
 0x11e   : > { %3512 = vmatpush3.msra.mxu0 %v2891_v60  ;;  %3556 = vmatpush3.msra.mxu1 %v2907_v61  ;;  %v2966_v60 = vld [vmem:[%s4888_s3 + $0x368] sm:$0xff] }
 0x11f   : > { %3513 = vmatprep.subr.mxu0 %v2890_v62  ;;  %3557 = vmatprep.subr.mxu1 %v2906_v63  ;;  %v2982_v61 = vld [vmem:[%s4888_s3 + $0x3e8] sm:$0xff] }
 0x120   : > { %3514 = vmatpush3.msra.mxu0 %v2890_v62  ;;  %3558 = vmatpush3.msra.mxu1 %v2906_v63  ;;  %v2965_v62 = vld [vmem:[%s4888_s3 + $0x360] sm:$0xff] }
 0x121   : > { %3515 = vmatprep.subr.mxu0 %v2889_v2  ;;  %3559 = vmatprep.subr.mxu1 %v2905_v3  ;;  %v2981_v63 = vld [vmem:[%s4888_s3 + $0x3e0] sm:$0xff] }
 0x122   : > { %3516 = vmatpush3.msra.mxu0 %v2889_v2  ;;  %3517 = vmatprep.mubr.f32.mxu0 %v1411_v59  ;;  %v2964_v2 = vld [vmem:[%s4888_s3 + $0x358] sm:$0xff]  ;;  %v2963_v59 = vld [vmem:[%s4888_s3 + $0x350] sm:$0xff] }
 0x123   : > { %3560 = vmatpush3.msra.mxu1 %v2905_v3  ;;  %3518 = vmatmul.mubr.f32.vlgmr.msra.gmra.mxu0 %v4374_v6  ;;  %v2980_v3 = vld [vmem:[%s4888_s3 + $0x3d8] sm:$0xff] }
 0x124   : > { %3562 = vmatmul.mubr.f32.vlgmr.msra.gmra.mxu1 %v4279_v35  ;;  %3573 = vmatprep.subr.mxu0 %v2936_v4 }
 0x125   : > { %3617 = vmatprep.subr.mxu1 %v2952_v5  ;;  %3520 = vmatprep.mubr.f32.mxu0 %v4381_v8 }
 0x126   : > { %3564 = vmatprep.mubr.f32.mxu1 %v4289_v34  ;;  %3574 = vmatpush3.msra.mxu0 %v2936_v4  ;;  %v2979_v4 = vld [vmem:[%s4888_s3 + $0x3d0] sm:$0xff] }
 0x127   : > { %3618 = vmatpush3.msra.mxu1 %v2952_v5  ;;  %3575 = vmatprep.subr.mxu0 %v2935_v10  ;;  %v2978_v5 = vld [vmem:[%s4888_s3 + $0x3c8] sm:$0xff] }
 0x128   : > { %3619 = vmatprep.subr.mxu1 %v2951_v11  ;;  %3576 = vmatpush3.msra.mxu0 %v2935_v10  ;;  %v4554_v10 = vld [vmem:[#allocation2 + $0x82] sm:$0xff] }
 0x129   : > { %3620 = vmatpush3.msra.mxu1 %v2951_v11  ;;  %3521 = vmatmul.mubr.f32.gmra.mxu0 %v4394_v13  ;;  %v2961_v11 = vld [vmem:[%s4888_s3 + $0x340] sm:$0xff] }
 0x12a   : > { %3565 = vmatmul.mubr.f32.gmra.mxu1 %v4302_v42  ;;  %3577 = vmatprep.subr.mxu0 %v2934_v12 }
 0x12b   : > { %3621 = vmatprep.subr.mxu1 %v2950_v14  ;;  %3523 = vmatprep.mubr.f32.mxu0 %v4401_v15 }
 0x12c   : > { %3567 = vmatprep.mubr.f32.mxu1 %v4308_v44  ;;  %3578 = vmatpush3.msra.mxu0 %v2934_v12  ;;  %v2977_v12 = vld [vmem:[%s4888_s3 + $0x3c0] sm:$0xff] }
 0x12d   : > { %3622 = vmatpush3.msra.mxu1 %v2950_v14  ;;  %3579 = vmatprep.subr.mxu0 %v2933_v17  ;;  %v2960_v14 = vld [vmem:[%s4888_s3 + $0x338] sm:$0xff] }
 0x12e   : > { %3623 = vmatprep.subr.mxu1 %v2949_v18  ;;  %3580 = vmatpush3.msra.mxu0 %v2933_v17  ;;  %v2976_v17 = vld [vmem:[%s4888_s3 + $0x3b8] sm:$0xff] }
 0x12f   : > { %3624 = vmatpush3.msra.mxu1 %v2949_v18  ;;  %3524 = vmatmul.mubr.f32.gmra.mxu0 %v4414_v20  ;;  %v2959_v18 = vld [vmem:[%s4888_s3 + $0x330] sm:$0xff] }
 0x130   : > { %3568 = vmatmul.mubr.f32.gmra.mxu1 %v4314_v46  ;;  %3581 = vmatprep.subr.mxu0 %v2932_v19 }
 0x131   : > { %3625 = vmatprep.subr.mxu1 %v2948_v21  ;;  %3526 = vmatprep.mubr.f32.mxu0 %v4421_v22 }
 0x132   : > { %3570 = vmatprep.mubr.f32.mxu1 %v4325_v50  ;;  %3582 = vmatpush3.msra.mxu0 %v2932_v19  ;;  %v2974_v19 = vld [vmem:[%s4888_s3 + $0x3a8] sm:$0xff] }
 0x133   : > { %3626 = vmatpush3.msra.mxu1 %v2948_v21  ;;  %3583 = vmatprep.subr.mxu0 %v2931_v9  ;;  %v2957_v21 = vld [vmem:[%s4888_s3 + $0x320] sm:$0xff] }
 0x134   : > { %3627 = vmatprep.subr.mxu1 %v2947_v23  ;;  %3584 = vmatpush3.msra.mxu0 %v2931_v9  ;;  %v2973_v9 = vld [vmem:[%s4888_s3 + $0x3a0] sm:$0xff] }
 0x135   : > { %3628 = vmatpush3.msra.mxu1 %v2947_v23  ;;  %3527 = vmatmul.mubr.f32.gmra.mxu0 %v4434_v25  ;;  %v2956_v23 = vld [vmem:[%s4888_s3 + $0x318] sm:$0xff] }
 0x136   : > { %3571 = vmatmul.mubr.f32.gmra.mxu1 %v4440_v28  ;;  %3585 = vmatprep.subr.mxu0 %v2930_v24 }
 0x137   : > { %3629 = vmatprep.subr.mxu1 %v2946_v26  ;;  %3586 = vmatpush3.msra.mxu0 %v2930_v24  ;;  %v2972_v24 = vld [vmem:[%s4888_s3 + $0x398] sm:$0xff] }
 0x138   : > { %3605 = vmatprep.mubr.f32.mxu0 %v4217_v48  ;;  %3630 = vmatpush3.msra.mxu1 %v2946_v26  ;;  %v2943_v48 = vld [vmem:[%s4888_s3 + $0x2b0] sm:$0xff] }
 0x139   : > { %3649 = vmatprep.mubr.f32.mxu1 %v4374_v6  ;;  %3587 = vmatprep.subr.mxu0 %v2929_v30  ;;  %v2962_v6 = vld [vmem:[%s4888_s3 + $0x348] sm:$0xff]  ;;  %v2955_v26 = vld [vmem:[%s4888_s3 + $0x310] sm:$0xff] }
 0x13a   : > { %3631 = vmatprep.subr.mxu1 %v2945_v31  ;;  %3588 = vmatpush3.msra.mxu0 %v2929_v30  ;;  %v2971_v30 = vld [vmem:[%s4888_s3 + $0x390] sm:$0xff] }
 0x13b   : > { %3632 = vmatpush3.msra.mxu1 %v2945_v31  ;;  %3589 = vmatprep.subr.mxu0 %v2928_v1  ;;  %v2954_v31 = vld [vmem:[%s4888_s3 + $0x308] sm:$0xff] }
 0x13c   : > { %3633 = vmatprep.subr.mxu1 %v2944_v33  ;;  %3590 = vmatpush3.msra.mxu0 %v2928_v1  ;;  %v2970_v1 = vld [vmem:[%s4888_s3 + $0x388] sm:$0xff] }
 0x13d   : > { %3634 = vmatpush3.msra.mxu1 %v2944_v33  ;;  %3591 = vmatprep.subr.mxu0 %v2927_v36  ;;  %v2953_v33 = vld [vmem:[%s4888_s3 + $0x300] sm:$0xff] }
 0x13e   : > { %3635 = vmatprep.subr.mxu1 %v2943_v48  ;;  %3592 = vmatpush3.msra.mxu0 %v2927_v36  ;;  %v2969_v36 = vld [vmem:[%s4888_s3 + $0x380] sm:$0xff] }
 0x13f   : > { %3636 = vmatpush3.msra.mxu1 %v2943_v48  ;;  %3593 = vmatprep.subr.mxu0 %v2926_v37  ;;  %v3000_v48 = vld [vmem:[%s4888_s3 + $0x478] sm:$0xff] }
 0x140   : > { %3637 = vmatprep.subr.mxu1 %v2942_v38  ;;  %3594 = vmatpush3.msra.mxu0 %v2926_v37  ;;  %v2999_v37 = vld [vmem:[%s4888_s3 + $0x470] sm:$0xff] }
 0x141   : > { %3638 = vmatpush3.msra.mxu1 %v2942_v38  ;;  %3595 = vmatprep.subr.mxu0 %v2925_v39  ;;  %v2998_v38 = vld [vmem:[%s4888_s3 + $0x468] sm:$0xff] }
 0x142   : > { %3639 = vmatprep.subr.mxu1 %v2941_v41  ;;  %3596 = vmatpush3.msra.mxu0 %v2925_v39  ;;  %v2986_v39 = vld [vmem:[%s4888_s3 + $0x408] sm:$0xff] }
 0x143   : > { %3640 = vmatpush3.msra.mxu1 %v2941_v41  ;;  %3597 = vmatprep.subr.mxu0 %v2924_v43  ;;  %v2985_v41 = vld [vmem:[%s4888_s3 + $0x400] sm:$0xff] }
 0x144   : > { %3641 = vmatprep.subr.mxu1 %v2940_v45  ;;  %3598 = vmatpush3.msra.mxu0 %v2924_v43  ;;  %v2248_v43 = vld [vmem:[#allocation2 + $0x92] sm:$0xff] }
 0x145   : > { %3642 = vmatpush3.msra.mxu1 %v2940_v45  ;;  %3599 = vmatprep.subr.mxu0 %v2923_v47  ;;  %v2417_v45 = vld [vmem:[%s4890_s5 + $0x78] sm:$0xff] }
 0x146   : > { %3643 = vmatprep.subr.mxu1 %v2939_v49  ;;  %3600 = vmatpush3.msra.mxu0 %v2923_v47  ;;  %v2411_v47 = vld [vmem:[%s4890_s5 + $0x48] sm:$0xff] }
 0x147   : > { %3644 = vmatpush3.msra.mxu1 %v2939_v49  ;;  %3601 = vmatprep.subr.mxu0 %v2922_v51  ;;  %v2410_v49 = vld [vmem:[%s4890_s5 + $0x40] sm:$0xff] }
 0x148   : > { %3645 = vmatprep.subr.mxu1 %v2938_v52  ;;  %3602 = vmatpush3.msra.mxu0 %v2922_v51  ;;  %v2409_v51 = vld [vmem:[%s4890_s5 + $0x38] sm:$0xff] }
 0x149   : > { %3646 = vmatpush3.msra.mxu1 %v2938_v52  ;;  %3603 = vmatprep.subr.mxu0 %v2921_v53  ;;  %v2408_v52 = vld [vmem:[%s4890_s5 + $0x30] sm:$0xff] }
 0x14a   : > { %3647 = vmatprep.subr.mxu1 %v2937_v54  ;;  %3604 = vmatpush3.msra.mxu0 %v2921_v53  ;;  %v2407_v53 = vld [vmem:[%s4890_s5 + $0x28] sm:$0xff] }
 0x14b   : > { %3648 = vmatpush3.msra.mxu1 %v2937_v54  ;;  %3606 = vmatmul.mubr.f32.vlgmr.msra.gmra.mxu0 %v4237_v7  ;;  %v2406_v54 = vld [vmem:[%s4890_s5 + $0x20] sm:$0xff] }
 0x14c   : > { %3650 = vmatmul.mubr.f32.vlgmr.msra.gmra.mxu1 %v4381_v8  ;;  %3661 = vmatprep.subr.mxu0 %v2968_v55 }
 0x14d   : > { %3705 = vmatprep.subr.mxu1 %v2984_v56  ;;  %3608 = vmatprep.mubr.f32.mxu0 %v4230_v0 }
 0x14e   : > { %3652 = vmatprep.mubr.f32.mxu1 %v4394_v13  ;;  %3662 = vmatpush3.msra.mxu0 %v2968_v55  ;;  %v2405_v55 = vld [vmem:[%s4890_s5 + $0x18] sm:$0xff] }
 0x14f   : > { %3706 = vmatpush3.msra.mxu1 %v2984_v56  ;;  %3663 = vmatprep.subr.mxu0 %v2967_v57  ;;  %v2404_v56 = vld [vmem:[%s4890_s5 + $0x10] sm:$0xff] }
 0x150   : > { %3707 = vmatprep.subr.mxu1 %v2983_v58  ;;  %3664 = vmatpush3.msra.mxu0 %v2967_v57  ;;  %v2403_v57 = vld [vmem:[%s4890_s5 + $0x8] sm:$0xff] }
 0x151   : > { %3708 = vmatpush3.msra.mxu1 %v2983_v58  ;;  %3609 = vmatmul.mubr.f32.gmra.mxu0 %v4266_v27  ;;  %v2402_v58 = vld [vmem:[%s4890_s5] sm:$0xff] }
 0x152   : > { %3653 = vmatmul.mubr.f32.gmra.mxu1 %v4401_v15  ;;  %3665 = vmatprep.subr.mxu0 %v2966_v60 }
 0x153   : > { %3709 = vmatprep.subr.mxu1 %v2982_v61  ;;  %3611 = vmatprep.mubr.f32.mxu0 %v4247_v16 }
 0x154   : > { %3655 = vmatprep.mubr.f32.mxu1 %v4414_v20  ;;  %3666 = vmatpush3.msra.mxu0 %v2966_v60 }
 0x155   : > { %3710 = vmatpush3.msra.mxu1 %v2982_v61  ;;  %3667 = vmatprep.subr.mxu0 %v2965_v62  ;;  %v2555_v61 = vld [vmem:[%s4892_s7 + $0x8] sm:$0xff] }
 0x156   : > { %3711 = vmatprep.subr.mxu1 %v2981_v63  ;;  %3668 = vmatpush3.msra.mxu0 %v2965_v62 }
 0x157   : > { %3712 = vmatpush3.msra.mxu1 %v2981_v63  ;;  %3612 = vmatmul.mubr.f32.gmra.mxu0 %v4276_v32 }
 0x158   : > { %3656 = vmatmul.mubr.f32.gmra.mxu1 %v4421_v22  ;;  %3669 = vmatprep.subr.mxu0 %v2964_v2 }
 0x159   : > { %3713 = vmatprep.subr.mxu1 %v2980_v3  ;;  %3614 = vmatprep.mubr.f32.mxu0 %v4269_v29 }
 0x15a   : > { %3658 = vmatprep.mubr.f32.mxu1 %v4434_v25  ;;  %3670 = vmatpush3.msra.mxu0 %v2964_v2  ;;  %v2554_v2 = vld [vmem:[%s4892_s7] sm:$0xff] }
 0x15b   : > { %3714 = vmatpush3.msra.mxu1 %v2980_v3  ;;  %3671 = vmatprep.subr.mxu0 %v2963_v59 }
 0x15c   : > { %3715 = vmatprep.subr.mxu1 %v2979_v4  ;;  %3672 = vmatpush3.msra.mxu0 %v2963_v59 }
 0x15d   : > { %3716 = vmatpush3.msra.mxu1 %v2979_v4  ;;  %3615 = vmatmul.mubr.f32.gmra.mxu0 %v4296_v40  ;;  %v3003_v4 = vld [vmem:[%s4011_s24 + $0x10] sm:$0xff] }
 0x15e   : > { %3659 = vmatmul.mubr.f32.gmra.mxu1 %v4554_v10  ;;  %3673 = vmatprep.subr.mxu0 %v2962_v6 }
 0x15f   : > { %3717 = vmatprep.subr.mxu1 %v2978_v5  ;;  %3674 = vmatpush3.msra.mxu0 %v2962_v6  ;;  %v3004_v6 = vld [vmem:[%s4011_s24 + $0x20] sm:$0xff] }
 0x160   : > { %3693 = vmatprep.mubr.f32.mxu0 %v4279_v35  ;;  %3718 = vmatpush3.msra.mxu1 %v2978_v5  ;;  %v2975_v35 = vld [vmem:[%s4888_s3 + $0x3b0] sm:$0xff] }
 0x161   : > { %3737 = vmatprep.mubr.f32.mxu1 %v4237_v7  ;;  %3675 = vmatprep.subr.mxu0 %v2961_v11  ;;  %v2958_v7 = vld [vmem:[%s4888_s3 + $0x328] sm:$0xff]  ;;  %v3005_v5 = vld [vmem:[%s4011_s24 + $0x30] sm:$0xff] }
 0x162   : > { %3719 = vmatprep.subr.mxu1 %v2977_v12  ;;  %3676 = vmatpush3.msra.mxu0 %v2961_v11  ;;  %v3006_v11 = vld [vmem:[%s4011_s24 + $0x40] sm:$0xff] }
 0x163   : > { %3720 = vmatpush3.msra.mxu1 %v2977_v12  ;;  %3677 = vmatprep.subr.mxu0 %v2960_v14 }
 0x164   : > { %3721 = vmatprep.subr.mxu1 %v2976_v17  ;;  %3678 = vmatpush3.msra.mxu0 %v2960_v14  ;;  %v3007_v14 = vld [vmem:[%s4011_s24 + $0x50] sm:$0xff] }
 0x165   : > { %3722 = vmatpush3.msra.mxu1 %v2976_v17  ;;  %3679 = vmatprep.subr.mxu0 %v2959_v18 }
 0x166   : > { %3723 = vmatprep.subr.mxu1 %v2975_v35  ;;  %3680 = vmatpush3.msra.mxu0 %v2959_v18 }
 0x167   : > { %3724 = vmatpush3.msra.mxu1 %v2975_v35  ;;  %3681 = vmatprep.subr.mxu0 %v2958_v7  ;;  %v3008_v35 = vld [vmem:[%s4011_s24 + $0x60] sm:$0xff] }
 0x168   : > { %3725 = vmatprep.subr.mxu1 %v2974_v19  ;;  %3682 = vmatpush3.msra.mxu0 %v2958_v7  ;;  %v3009_v7 = vld [vmem:[%s4011_s24 + $0x70] sm:$0xff] }
 0x169   : > { %3726 = vmatpush3.msra.mxu1 %v2974_v19  ;;  %3683 = vmatprep.subr.mxu0 %v2957_v21 }
 0x16a   : > { %3727 = vmatprep.subr.mxu1 %v2973_v9  ;;  %3684 = vmatpush3.msra.mxu0 %v2957_v21 }
 0x16b   : > { %3728 = vmatpush3.msra.mxu1 %v2973_v9  ;;  %3685 = vmatprep.subr.mxu0 %v2956_v23  ;;  %v3010_v9 = vld [vmem:[%s4011_s24 + $0x80] sm:$0xff] }
 0x16c   : > { %3729 = vmatprep.subr.mxu1 %v2972_v24  ;;  %3686 = vmatpush3.msra.mxu0 %v2956_v23 }
 0x16d   : > { %3730 = vmatpush3.msra.mxu1 %v2972_v24  ;;  %3687 = vmatprep.subr.mxu0 %v2955_v26 }
 0x16e   : > { %3731 = vmatprep.subr.mxu1 %v2971_v30  ;;  %3688 = vmatpush3.msra.mxu0 %v2955_v26 }
 0x16f   : > { %3732 = vmatpush3.msra.mxu1 %v2971_v30  ;;  %3689 = vmatprep.subr.mxu0 %v2954_v31 }
 0x170   : > { %3733 = vmatprep.subr.mxu1 %v2970_v1  ;;  %3690 = vmatpush3.msra.mxu0 %v2954_v31 }
 0x171   : > { %3734 = vmatpush3.msra.mxu1 %v2970_v1  ;;  %3691 = vmatprep.subr.mxu0 %v2953_v33 }
 0x172   : > { %3735 = vmatprep.subr.mxu1 %v2969_v36  ;;  %3692 = vmatpush3.msra.mxu0 %v2953_v33 }
 0x173   : > { %3736 = vmatpush3.msra.mxu1 %v2969_v36  ;;  %3694 = vmatmul.mubr.f32.vlgmr.msra.gmra.mxu0 %v4289_v34  ;;  %v1972_v34 = vld [vmem:[#allocation2 + $0x90] sm:$0xff] }
 0x174   : > { %3738 = vmatmul.mubr.f32.vlgmr.msra.gmra.mxu1 %v4230_v0  ;;  %3749 = vmatprep.subr.mxu0 %v3000_v48  ;;  %v2997_v0 = vld [vmem:[%s4888_s3 + $0x460] sm:$0xff] }
 0x175   : > { %3696 = vmatprep.mubr.f32.mxu0 %v4302_v42  ;;  %3740 = vmatprep.mubr.f32.mxu1 %v4266_v27  ;;  %v2996_v27 = vld [vmem:[%s4888_s3 + $0x458] sm:$0xff]  ;;  %v3899_v42 = vld [vmem:[#allocation2 + $0x1] sm:$0xff] }
 0x176   : > { %3750 = vmatpush3.msra.mxu0 %v3000_v48  ;;  %3793 = vmatprep.subr.mxu1 %v2417_v45 }
 0x177   : > { %3751 = vmatprep.subr.mxu0 %v2999_v37  ;;  %3697 = vmatmul.mubr.f32.gmra.mxu0 %v4308_v44  ;;  %v2991_v44 = vld [vmem:[%s4888_s3 + $0x430] sm:$0xff] }
 0x178   : > { %3752 = vmatpush3.msra.mxu0 %v2999_v37  ;;  %3741 = vmatmul.mubr.f32.gmra.mxu1 %v4247_v16  ;;  %v2995_v16 = vld [vmem:[%s4888_s3 + $0x450] sm:$0xff] }
 0x179   : > { %3753 = vmatprep.subr.mxu0 %v2998_v38  ;;  %3699 = vmatprep.mubr.f32.mxu0 %v4314_v46  ;;  %v2990_v46 = vld [vmem:[%s4888_s3 + $0x428] sm:$0xff] }
 0x17a   : > { %3743 = vmatprep.mubr.f32.mxu1 %v4276_v32  ;;  %3754 = vmatpush3.msra.mxu0 %v2998_v38  ;;  %v2994_v32 = vld [vmem:[%s4888_s3 + $0x448] sm:$0xff] }
 0x17b   : > { %3755 = vmatprep.subr.mxu0 %v2997_v0  ;;  %3700 = vmatmul.mubr.f32.gmra.mxu0 %v4325_v50  ;;  %v2989_v50 = vld [vmem:[%s4888_s3 + $0x420] sm:$0xff] }
 0x17c   : > { %3756 = vmatpush3.msra.mxu0 %v2997_v0  ;;  %3744 = vmatmul.mubr.f32.gmra.mxu1 %v4269_v29  ;;  %v2993_v29 = vld [vmem:[%s4888_s3 + $0x440] sm:$0xff] }
 0x17d   : > { %3757 = vmatprep.subr.mxu0 %v2996_v27  ;;  %3702 = vmatprep.mubr.f32.mxu0 %v4440_v28  ;;  %v2987_v28 = vld [vmem:[%s4888_s3 + $0x410] sm:$0xff] }
 0x17e   : > { %3746 = vmatprep.mubr.f32.mxu1 %v4296_v40  ;;  %3758 = vmatpush3.msra.mxu0 %v2996_v27  ;;  %v2992_v40 = vld [vmem:[%s4888_s3 + $0x438] sm:$0xff] }
 0x17f   : > { %3759 = vmatprep.subr.mxu0 %v2995_v16  ;;  %3703 = vmatmul.mubr.f32.gmra.mxu0 %v1972_v34 }
 0x180   : > { %3760 = vmatpush3.msra.mxu0 %v2995_v16  ;;  %3781 = vmatprep.mubr.f32.mxu0 %v4381_v8  ;;  %v2988_v8 = vld [vmem:[%s4888_s3 + $0x418] sm:$0xff] }
 0x181   : > { %3761 = vmatprep.subr.mxu0 %v2994_v32  ;;  %3747 = vmatmul.mubr.f32.gmra.mxu1 %v3899_v42 }
 0x182   : > { %3762 = vmatpush3.msra.mxu0 %v2994_v32  ;;  %3794 = vmatpush3.msra.mxu1 %v2417_v45 }
 0x183   : > { %3763 = vmatprep.subr.mxu0 %v2993_v29 }
 0x184   : > { %3764 = vmatpush3.msra.mxu0 %v2993_v29 }
 0x185   : > { %3765 = vmatprep.subr.mxu0 %v2992_v40 }
 0x186   : > { %3766 = vmatpush3.msra.mxu0 %v2992_v40 }
 0x187   : > { %3767 = vmatprep.subr.mxu0 %v2991_v44 }
 0x188   : > { %3768 = vmatpush3.msra.mxu0 %v2991_v44 }
 0x189   : > { %3769 = vmatprep.subr.mxu0 %v2990_v46 }
 0x18a   : > { %3770 = vmatpush3.msra.mxu0 %v2990_v46 }
 0x18b   : > { %3771 = vmatprep.subr.mxu0 %v2989_v50 }
 0x18c   : > { %3772 = vmatpush3.msra.mxu0 %v2989_v50 }
 0x18d   : > { %3773 = vmatprep.subr.mxu0 %v2988_v8 }
 0x18e   : > { %3774 = vmatpush3.msra.mxu0 %v2988_v8 }
 0x18f   : > { %3775 = vmatprep.subr.mxu0 %v2987_v28 }
 0x190   : > { %3776 = vmatpush3.msra.mxu0 %v2987_v28 }
 0x191   : > { %3777 = vmatprep.subr.mxu0 %v2986_v39 }
 0x192   : > { %3778 = vmatpush3.msra.mxu0 %v2986_v39 }
 0x193   : > { %3779 = vmatprep.subr.mxu0 %v2985_v41 }
 0x194   : > { %3780 = vmatpush3.msra.mxu0 %v2985_v41 }
 0x195   : > { %3782 = vmatmul.mubr.f32.vlgmr.msra.gmra.mxu0 %v4394_v13  ;;  %v2416_v13 = vld [vmem:[%s4890_s5 + $0x70] sm:$0xff]  ;;  %3837 = vmatprep.subr.mxu0 %v2555_v61 }
 0x196   : > { %3784 = vmatprep.mubr.f32.mxu0 %v4401_v15  ;;  %3795 = vmatprep.subr.mxu1 %v2416_v13  ;;  %v2415_v15 = vld [vmem:[%s4890_s5 + $0x68] sm:$0xff] }
 0x197   : > { %3796 = vmatpush3.msra.mxu1 %v2416_v13  ;;  %3838 = vmatpush3.msra.mxu0 %v2555_v61 }
 0x198   : > { %3797 = vmatprep.subr.mxu1 %v2415_v15  ;;  %3839 = vmatprep.subr.mxu0 %v2554_v2 }
 0x199   : > { %3785 = vmatmul.mubr.f32.gmra.mxu0 %v4414_v20  ;;  %3798 = vmatpush3.msra.mxu1 %v2415_v15  ;;  %v2414_v20 = vld [vmem:[%s4890_s5 + $0x60] sm:$0xff] }
 0x19a   : > { %3787 = vmatprep.mubr.f32.mxu0 %v4421_v22  ;;  %v2413_v22 = vld [vmem:[%s4890_s5 + $0x58] sm:$0xff]  ;;  %3799 = vmatprep.subr.mxu1 %v2414_v20 }
 0x19b   : > { %3800 = vmatpush3.msra.mxu1 %v2414_v20  ;;  %3840 = vmatpush3.msra.mxu0 %v2554_v2 }
 0x19c   : > { %3801 = vmatprep.subr.mxu1 %v2413_v22 }
 0x19d   : > { %3788 = vmatmul.mubr.f32.gmra.mxu0 %v4434_v25  ;;  %v2412_v25 = vld [vmem:[%s4890_s5 + $0x50] sm:$0xff]  ;;  %3802 = vmatpush3.msra.mxu1 %v2413_v22 }
 0x19e   : > { %3790 = vmatprep.mubr.f32.mxu0 %v4554_v10  ;;  %3803 = vmatprep.subr.mxu1 %v2412_v25 }
 0x19f   : > { %3804 = vmatpush3.msra.mxu1 %v2412_v25 }
 0x1a0   : > { %3805 = vmatprep.subr.mxu1 %v2411_v47 }
 0x1a1   : > { %3791 = vmatmul.mubr.f32.gmra.mxu0 %v2248_v43  ;;  %3806 = vmatpush3.msra.mxu1 %v2411_v47 }
 0x1a2   : > { %3807 = vmatprep.subr.mxu1 %v2410_v49  ;;  %3841 = vmatprep.mubr.msk.f32.mxu0 %vm395_vm0, %v3003_v4 }
 0x1a3   : > { %3808 = vmatpush3.msra.mxu1 %v2410_v49 }
 0x1a4   : > { %3809 = vmatprep.subr.mxu1 %v2409_v51 }
 0x1a5   : > { %3810 = vmatpush3.msra.mxu1 %v2409_v51  ;;  %3842 = vmatmul.mubr.msk.f32.vlgmr.msra.gmra.mxu0 %vm395_vm0, %v3004_v6 }
 0x1a6   : > { %3811 = vmatprep.subr.mxu1 %v2408_v52  ;;  %3844 = vmatprep.mubr.msk.f32.mxu0 %vm395_vm0, %v3005_v5 }
 0x1a7   : > { %3812 = vmatpush3.msra.mxu1 %v2408_v52 }
 0x1a8   : > { %3813 = vmatprep.subr.mxu1 %v2407_v53 }
 0x1a9   : > { %3814 = vmatpush3.msra.mxu1 %v2407_v53  ;;  %3845 = vmatmul.mubr.msk.f32.gmra.mxu0 %vm395_vm0, %v3006_v11 }
 0x1aa   : > { %3815 = vmatprep.subr.mxu1 %v2406_v54  ;;  %3847 = vmatprep.mubr.msk.f32.mxu0 %vm395_vm0, %v3007_v14 }
 0x1ab   : > { %3816 = vmatpush3.msra.mxu1 %v2406_v54 }
 0x1ac   : > { %3817 = vmatprep.subr.mxu1 %v2405_v55 }
 0x1ad   : > { %3818 = vmatpush3.msra.mxu1 %v2405_v55  ;;  %3848 = vmatmul.mubr.msk.f32.gmra.mxu0 %vm395_vm0, %v3008_v35 }
 0x1ae   : > { %3819 = vmatprep.subr.mxu1 %v2404_v56  ;;  %3850 = vmatprep.mubr.msk.f32.mxu0 %vm395_vm0, %v3009_v7 }
 0x1af   : > { %3820 = vmatpush3.msra.mxu1 %v2404_v56 }
 0x1b0   : > { %3821 = vmatprep.subr.mxu1 %v2403_v57 }
 0x1b1   : > { %3822 = vmatpush3.msra.mxu1 %v2403_v57  ;;  %3851 = vmatmul.mubr.msk.f32.gmra.mxu0 %vm395_vm0, %v3010_v9 }
 0x1b2   : > { %3823 = vmatprep.subr.mxu1 %v2402_v58 }
 0x1b3   : > { %3824 = vmatpush3.msra.mxu1 %v2402_v58 }
 0x1b9   : > { %v4728_v60 = vpop.f32.mrf.mxu0 }
 0x1bb   : > { %v4733_v62 = vpop.f32.mrf.mxu0 }
 0x1c1   : > { %v4735_v63 = vpop.f32.mrf.mxu0  ;;  %v4742_v59 = vpop.f32.mrf.mxu1 }
 0x1c2   : > { %v1378_v2 = vadd.f32 %v4742_v59, %v4728_v60 }
 0x1c3   : > { %v4740_v3 = vpop.f32.mrf.mxu0  ;;  %v1372_v12 = vpop.f32.mrf.mxu1 }
 0x1c4   : > { %v1373_v4 = vadd.f32 %v1372_v12, %v4733_v62 }
 0x1c8   : > { %v4748_v10 = vpop.f32.mrf.mxu0 }
 0x1c9   : > { %v3478_v17 = vpop.f32.mrf.mxu1 }
 0x1ca   : > { %v4754_v18 = vpop.f32.mrf.mxu0  ;;  %v1388_v14 = vadd.f32 %v3478_v17, %v4735_v63 }
 0x1cb   : > { %v1382_v19 = vpop.f32.mrf.mxu1 }
 0x1cc   : > { %v1383_v9 = vadd.f32 %v1382_v19, %v4740_v3 }
 0x1cd   : > { %v3481_v23 = vpop.f32.mrf.mxu1 }
 0x1ce   : > { %v1398_v60 = vadd.f32 %v3481_v23, %v4748_v10 }
 0x1cf   : > { %v1392_v30 = vpop.f32.mrf.mxu1 }
 0x1d1   : > { %v4760_v21 = vpop.f32.mrf.mxu0 }
 0x1d2   : > { %v4768_v1 = vpop.f32.mrf.mxu1 }
 0x1d3   : > { %v4765_v24 = vpop.f32.mrf.mxu0  ;;  %v1408_v3 = vadd.f32 %v4768_v1, %v4760_v21  ;;  %v3001_v1 = vld [vmem:[%s4889_s4] ss:$0 sm:$0xff] }
 0x1d4   : > { %v4770_v36 = vpop.f32.mrf.mxu1 }
 0x1e3   : > { %v3519_v26 = vpop.f32.mrf.mxu0 }
 0x1e4   : > { %v3563_v48 = vpop.f32.mrf.mxu1  ;;  %v1542_v6 = vadd.f32 %v3519_v26, %v1378_v2  ;;  %v1393_v26 = vadd.f32 %v1392_v30, %v4754_v18 }
 0x1e5   : > { %v1502_v31 = vpop.f32.mrf.mxu0 }
 0x1e6   : > { %v1641_v38 = vpop.f32.mrf.mxu1  ;;  %v1681_v35 = vadd.f32 %v3563_v48, %v1542_v6  ;;  %v1541_v7 = vadd.f32 %v1502_v31, %v1373_v4 }
 0x1e9   : > { %v3522_v33 = vpop.f32.mrf.mxu0 }
 0x1ea   : > { %v3566_v27 = vpop.f32.mrf.mxu1 }
 0x1eb   : > { %v1512_v37 = vpop.f32.mrf.mxu0 }
 0x1ec   : > { %v1651_v34 = vpop.f32.mrf.mxu1 }
 0x1ef   : > { %v3525_v0 = vpop.f32.mrf.mxu0 }
 0x1f0   : > { %v3569_v29 = vpop.f32.mrf.mxu1 }
 0x1f1   : > { %v1522_v16 = vpop.f32.mrf.mxu0 }
 0x1f2   : > { %v1661_v44 = vpop.f32.mrf.mxu1  ;;  %v1545_v19 = vadd.f32 %v1522_v16, %v1393_v26 }
 0x1f4   : > { %v1684_v18 = vadd.f32 %v1661_v44, %v1545_v19 }
 0x1f5   : > { %v4772_v32 = vpop.f32.mrf.mxu0 }
 0x1f6   : > { %v4776_v50 = vpop.f32.mrf.mxu1  ;;  %v1548_v30 = vadd.f32 %v4772_v32, %v1408_v3 }
 0x1f7   : > { %v4774_v42 = vpop.f32.mrf.mxu0 }
 0x1f8   : > { %v4778_v28 = vpop.f32.mrf.mxu1  ;;  %v1687_v16 = vadd.f32 %v4776_v50, %v1548_v30 }
 0x1f9   : > { %4895 = vst [vmem:[#allocation3_spill] sm:$0xff] %v4778_v28 }
 0x20b   : > { %v3607_v40 = vpop.f32.mrf.mxu0 }
 0x20c   : > { %v3651_v39 = vpop.f32.mrf.mxu1 }
 0x20d   : > { %v1779_v46 = vpop.f32.mrf.mxu0 }
 0x20e   : > { %v1917_v43 = vpop.f32.mrf.mxu1 }
 0x211   : > { %v3610_v8 = vpop.f32.mrf.mxu0 }
 0x212   : > { %v3654_v13 = vpop.f32.mrf.mxu1 }
 0x213   : > { %v1789_v41 = vpop.f32.mrf.mxu0 }
 0x214   : > { %v1927_v20 = vpop.f32.mrf.mxu1 }
 0x217   : > { %v3613_v45 = vpop.f32.mrf.mxu0 }
 0x218   : > { %v3657_v25 = vpop.f32.mrf.mxu1 }
 0x219   : > { %v1799_v15 = vpop.f32.mrf.mxu0 }
 0x21a   : > { %v4784_v51 = vpop.f32.mrf.mxu1 }
 0x21b   : > { %4898 = vst [vmem:[#allocation6_spill] sm:$0xff] %v4784_v51 }
 0x21d   : > { %v4780_v22 = vpop.f32.mrf.mxu0 }
 0x21e   : > { %4896 = vst [vmem:[#allocation4_spill] sm:$0xff] %v4780_v22  ;;  %v4786_v53 = vpop.f32.mrf.mxu1  ;;  %v1543_v22 = vadd.f32 %v1512_v37, %v1383_v9 }
 0x21f   : > { %v4782_v47 = vpop.f32.mrf.mxu0  ;;  %4899 = vst [vmem:[#allocation7_spill] sm:$0xff] %v4786_v53  ;;  %v1819_v53 = vadd.f32 %v3607_v40, %v1681_v35 }
 0x220   : > { %4897 = vst [vmem:[#allocation5_spill] sm:$0xff] %v4782_v47  ;;  %v4788_v55 = vpop.f32.mrf.mxu1  ;;  %v1544_v47 = vadd.f32 %v3522_v33, %v1388_v14  ;;  %v1682_v2 = vadd.f32 %v1651_v34, %v1543_v22 }
 0x221   : > { %4900 = vst [vmem:[#allocation8_spill] sm:$0xff] %v4788_v55  ;;  %v1680_v55 = vadd.f32 %v1641_v38, %v1541_v7  ;;  %v1957_v62 = vadd.f32 %v3651_v39, %v1819_v53 }
 0x222   : > { %v1683_v59 = vadd.f32 %v3566_v27, %v1544_v47  ;;  %v1820_v33 = vadd.f32 %v1789_v41, %v1682_v2  ;;  %v1403_v27 = vadd.f32 %v4770_v36, %v4765_v24  ;;  %v1822_v41 = vadd.f32 %v1799_v15, %v1684_v18  ;;  %v4903_v22 = vld [vmem:[#allocation6_spill] sm:$0xff] }
 0x223   : > { %v1818_v12 = vadd.f32 %v1779_v46, %v1680_v55 }
 0x224   : > { %v1821_v17 = vadd.f32 %v3610_v8, %v1683_v59  ;;  %v1960_v47 = vadd.f32 %v4903_v22, %v1822_v41 }
 0x225   : > { %v1956_v63 = vadd.f32 %v1917_v43, %v1818_v12 }
 0x226   : > { %v1959_v40 = vadd.f32 %v3654_v13, %v1821_v17  ;;  %v4905_v15 = vld [vmem:[#allocation7_spill] sm:$0xff] }
 0x228   : > { %v4908_v9 = vld [vmem:[#allocation8_spill] sm:$0xff] }
 0x233   : > { %v3695_v49 = vpop.f32.mrf.mxu0 }
 0x234   : > { %v3739_v56 = vpop.f32.mrf.mxu1  ;;  %v2096_v31 = vadd.f32 %v3695_v49, %v1957_v62  ;;  %v4904_v49 = vld [vmem:[#allocation4_spill] sm:$0xff] }
 0x235   : > { %v2056_v52 = vpop.f32.mrf.mxu0 }
 0x236   : > { %v2194_v58 = vpop.f32.mrf.mxu1  ;;  %v2234_v10 = vadd.f32 %v3739_v56, %v2096_v31  ;;  %v2095_v23 = vadd.f32 %v2056_v52, %v1956_v63  ;;  %v1825_v52 = vadd.f32 %v4904_v49, %v1687_v16 }
 0x237   : > { %v3698_v54 = vpop.f32.mrf.mxu0 }
 0x238   : > { %v3742_v5 = vpop.f32.mrf.mxu1  ;;  %v2233_v8 = vadd.f32 %v2194_v58, %v2095_v23  ;;  %v2098_v39 = vadd.f32 %v3698_v54, %v1959_v40  ;;  %v1963_v58 = vadd.f32 %v4905_v15, %v1825_v52  ;;  %v3011_v52 = vld [vmem:[%s4893_s8] ss:$0 sm:$0xff] }
 0x239   : > { %v2066_v57 = vpop.f32.mrf.mxu0 }
 0x23a   : > { %v2204_v51 = vpop.f32.mrf.mxu1  ;;  %v2236_v44 = vadd.f32 %v3742_v5, %v2098_v39  ;;  %v3002_v39 = vld [vmem:[%s4891_s6] ss:$0 sm:$0xff] }
 0x23b   : > { %v3701_v61 = vpop.f32.mrf.mxu0 }
 0x23c   : > { %v3745_v48 = vpop.f32.mrf.mxu1 }
 0x23d   : > { %v4793_v11 = vpop.f32.mrf.mxu0 }
 0x23e   : > { %4901 = vst [vmem:[#allocation9_spill] sm:$0xff] %v4793_v11  ;;  %v1546_v11 = vadd.f32 %v3525_v0, %v1398_v60  ;;  %v1958_v0 = vadd.f32 %v1927_v20, %v1820_v33  ;;  %v2214_v43 = vpop.f32.mrf.mxu1  ;;  %v4902_v20 = vld [vmem:[#allocation3_spill] sm:$0xff] }
 0x23f   : > { %v3704_v28 = vpop.f32.mrf.mxu0 }
 0x240   : > { %v1685_v38 = vadd.f32 %v3569_v29, %v1546_v11  ;;  %v1547_v29 = vadd.f32 %v4774_v42, %v1403_v27  ;;  %v2097_v32 = vadd.f32 %v2066_v57, %v1958_v0  ;;  %v2102_v12 = vadd.f32 %v3704_v28, %v1963_v58 }
 0x241   : > { %v2086_v37 = vpop.f32.mrf.mxu0  ;;  %v3748_v57 = vpop.f32.mrf.mxu1 }
 0x242   : > { %v1823_v46 = vadd.f32 %v3613_v45, %v1685_v38  ;;  %v1686_v45 = vadd.f32 %v4902_v20, %v1547_v29  ;;  %v2235_v55 = vadd.f32 %v2204_v51, %v2097_v32  ;;  %v2240_v3 = vadd.f32 %v3748_v57, %v2102_v12 }
 0x243   : > { %v2224_v63 = vpop.f32.mrf.mxu1 }
 0x244   : > { %v1961_v36 = vadd.f32 %v3657_v25, %v1823_v46  ;;  %v4906_v25 = vld [vmem:[#allocation5_spill] sm:$0xff] }
 0x245   : > { %v1824_v4 = vadd.f32 %v4906_v25, %v1686_v45  ;;  %v4907_v11 = vld [vmem:[#allocation9_spill] sm:$0xff] }
 0x246   : > { %v2100_v50 = vadd.f32 %v3701_v61, %v1961_v36  ;;  %v2099_v14 = vadd.f32 %v4907_v11, %v1960_v47 }
 0x247   : > { %v1962_v60 = vadd.f32 %v4908_v9, %v1824_v4 }
 0x248   : > { %v2238_v5 = vadd.f32 %v3745_v48, %v2100_v50  ;;  %v2237_v62 = vadd.f32 %v2214_v43, %v2099_v14 }
 0x249   : > { %v2101_v31 = vadd.f32 %v2086_v37, %v1962_v60 }
 0x24b   : > { %v2239_v28 = vadd.f32 %v2224_v63, %v2101_v31 }
 0x255   : > { %v3783_v34 = vpop.f32.mrf.mxu0 }
 0x256   : > { %v2372_v21 = vadd.f32 %v3783_v34, %v2234_v10 }
 0x257   : > { %v2332_v24 = vpop.f32.mrf.mxu0 }
 0x258   : > { %v2371_v13 = vadd.f32 %v2332_v24, %v2233_v8  ;;  %v4812_v53 = vadd.f32 %v3001_v1, %v2372_v21 }
 0x259   : > { %v3786_v54 = vpop.f32.mrf.mxu0 }
 0x25a   : > { %v4814_v56 = vadd.f32 %v3001_v1, %v2371_v13  ;;  %v2374_v42 = vadd.f32 %v3786_v54, %v2236_v44  ;;  %v2395_v51 = vmul.f32 %v4812_v53, %v4812_v53 }
 0x25b   : > { %v2342_v6 = vpop.f32.mrf.mxu0 }
 0x25c   : > { %v2373_v35 = vadd.f32 %v2342_v6, %v2235_v55  ;;  %v2394_v7 = vmul.f32 %v4814_v56, %v4814_v56  ;;  %v4824_v61 = vadd.f32 %v3001_v1, %v2374_v42 }
 0x25d   : > { %v3789_v59 = vpop.f32.mrf.mxu0 }
 0x25e   : > { %v4826_v26 = vadd.f32 %v3001_v1, %v2373_v35  ;;  %v2376_v2 = vadd.f32 %v3789_v59, %v2238_v5  ;;  %3825 = vmatprep.mubr.f32.mxu1 %v2394_v7  ;;  %v2397_v40 = vmul.f32 %v4824_v61, %v4824_v61 }
 0x25f   : > { %v2352_v17 = vpop.f32.mrf.mxu0  ;;  %3826 = vmatmul.mubr.f32.vlgmr.msra.gmra.mxu1 %v2395_v51 }
 0x260   : > { %v2375_v19 = vadd.f32 %v2352_v17, %v2237_v62  ;;  %v2396_v33 = vmul.f32 %v4826_v26, %v4826_v26  ;;  %v4830_v48 = vadd.f32 %v3001_v1, %v2376_v2 }
 0x261   : > { %v3792_v38 = vpop.f32.mrf.mxu0 }
 0x262   : > { %v4834_v10 = vadd.f32 %v3001_v1, %v2375_v19  ;;  %v2378_v23 = vadd.f32 %v3792_v38, %v2240_v3  ;;  %3828 = vmatprep.mubr.f32.mxu1 %v2396_v33  ;;  %v2399_v0 = vmul.f32 %v4830_v48, %v4830_v48 }
 0x263   : > { %v2362_v27 = vpop.f32.mrf.mxu0  ;;  %3829 = vmatmul.mubr.f32.gmra.mxu1 %v2397_v40 }
 0x264   : > { %v2377_v18 = vadd.f32 %v2362_v27, %v2239_v28  ;;  %v2398_v37 = vmul.f32 %v4834_v10, %v4834_v10  ;;  %v4838_v30 = vadd.f32 %v3001_v1, %v2378_v23 }
 0x265   : > { %v3843_v16 = vpop.f32.mrf.mxu0 }
 0x266   : > { %v4842_v34 = vadd.f32 %v3001_v1, %v2377_v18  ;;  %3831 = vmatprep.mubr.f32.mxu1 %v2398_v37  ;;  %v2401_v8 = vmul.f32 %v4838_v30, %v4838_v30  ;;  %v2659_v15 = vadd.f32 %v3843_v16, %v3011_v52 }
 0x267   : > { %3832 = vmatmul.mubr.f32.gmra.mxu1 %v2399_v0  ;;  %v2653_v24 = vpop.f32.mrf.mxu0 }
 0x268   : > { %v2400_v46 = vmul.f32 %v4842_v34, %v4842_v34  ;;  %v2654_v11 = vadd.f32 %v3011_v52, %v2653_v24 }
 0x269   : > { %v3846_v20 = vpop.f32.mrf.mxu0 }
 0x26a   : > { %3834 = vmatprep.mubr.f32.mxu1 %v2400_v46  ;;  %v2669_v14 = vadd.f32 %v3846_v20, %v3011_v52 }
 0x26b   : > { %3835 = vmatmul.mubr.f32.gmra.mxu1 %v2401_v8  ;;  %v2663_v54 = vpop.f32.mrf.mxu0 }
 0x26c   : > { %v2664_v62 = vadd.f32 %v3011_v52, %v2663_v54 }
 0x26d   : > { %v3849_v25 = vpop.f32.mrf.mxu0 }
 0x26e   : > { %v2679_v12 = vadd.f32 %v3849_v25, %v3011_v52 }
 0x26f   : > { %v2673_v7 = vpop.f32.mrf.mxu0 }
 0x270   : > { %v2674_v19 = vadd.f32 %v3011_v52, %v2673_v7 }
 0x31f   : > { %v3827_v21 = vpop.f32.mrf.mxu1 }
 0x320   : > { %v2497_v29 = vadd.f32 %v3827_v21, %v3002_v39 }
 0x321   : > { %v2491_v41 = vpop.f32.mrf.mxu1 }
 0x322   : > { %3883 = vrsqrt.f32 %v2497_v29  ;;  %v2492_v1 = vadd.f32 %v3002_v39, %v2491_v41 }
 0x323   : > { %v3830_v43 = vpop.f32.mrf.mxu1 }
 0x324   : > { %3885 = vrsqrt.f32 %v2492_v1  ;;  %v2507_v36 = vadd.f32 %v3830_v43, %v3002_v39 }
 0x325   : > { %v2501_v44 = vpop.f32.mrf.mxu1 }
 0x326   : > { %3887 = vrsqrt.f32 %v2507_v36  ;;  %v2502_v32 = vadd.f32 %v3002_v39, %v2501_v44 }
 0x327   : > { %v3833_v13 = vpop.f32.mrf.mxu1 }
 0x328   : > { %3889 = vrsqrt.f32 %v2502_v32  ;;  %v2517_v45 = vadd.f32 %v3833_v13, %v3002_v39 }
 0x329   : > { %v2511_v22 = vpop.f32.mrf.mxu1 }
 0x32a   : > { %3891 = vrsqrt.f32 %v2517_v45  ;;  %v2512_v47 = vadd.f32 %v3002_v39, %v2511_v22 }
 0x32b   : > { %v3836_v49 = vpop.f32.mrf.mxu1 }
 0x32c   : > { %3893 = vrsqrt.f32 %v2512_v47  ;;  %v2527_v55 = vadd.f32 %v3836_v49, %v3002_v39 }
 0x32d   : > { %v2521_v50 = vpop.f32.mrf.mxu1 }
 0x32e   : > { %3895 = vrsqrt.f32 %v2527_v55  ;;  %v2522_v42 = vadd.f32 %v3002_v39, %v2521_v50 }
 0x32f   : > { %v3884_v58 = vpop.eup %3883 }
 0x330   : > { %3897 = vrsqrt.f32 %v2522_v42  ;;  %v2539_v4 = vmul.f32 %v3884_v58, %v4812_v53 }
 0x331   : > { %v3886_v57 = vpop.eup %3885 }
 0x332   : > { %v2693_v6 = vadd.f32 %v2659_v15, %v2539_v4  ;;  %v2538_v5 = vmul.f32 %v3886_v57, %v4814_v56  ;;  %v3852_v56 = vpop.f32.mrf.mxu0 }
 0x333   : > { %v3888_v35 = vpop.eup %3887  ;;  %v2689_v33 = vadd.f32 %v3852_v56, %v3011_v52 }
 0x334   : > { %2701 = vst [vmem:[%s4859_s14 + $0x8] sm:$0xff] %v2693_v6  ;;  %v2692_v9 = vadd.f32 %v2654_v11, %v2538_v5  ;;  %v2541_v53 = vmul.f32 %v3888_v35, %v4824_v61  ;;  %v2683_v38 = vpop.f32.mrf.mxu0 }
 0x335   : > { %v3890_v60 = vpop.eup %3889  ;;  %v2684_v18 = vadd.f32 %v3011_v52, %v2683_v38 }
 0x336   : > { %2700 = vst [vmem:[%s4859_s14] sm:$0xff] %v2692_v9  ;;  %v2695_v51 = vadd.f32 %v2669_v14, %v2541_v53  ;;  %v2540_v59 = vmul.f32 %v3890_v60, %v4826_v26 }
 0x337   : > { %v3892_v2 = vpop.eup %3891 }
 0x338   : > { %2703 = vst [vmem:[%s4859_s14 + $0x18] sm:$0xff] %v2695_v51  ;;  %v2694_v63 = vadd.f32 %v2664_v62, %v2540_v59  ;;  %v2543_v17 = vmul.f32 %v3892_v2, %v4830_v48 }
 0x339   : > { %v3894_v31 = vpop.eup %3893 }
 0x33a   : > { %2702 = vst [vmem:[%s4859_s14 + $0x10] sm:$0xff] %v2694_v63  ;;  %v2697_v3 = vadd.f32 %v2679_v12, %v2543_v17  ;;  %v2542_v61 = vmul.f32 %v3894_v31, %v4834_v10 }
 0x33b   : > { %v3896_v26 = vpop.eup %3895 }
 0x33c   : > { %2705 = vst [vmem:[%s4859_s14 + $0x28] sm:$0xff] %v2697_v3  ;;  %v2696_v40 = vadd.f32 %v2674_v19, %v2542_v61  ;;  %v2545_v28 = vmul.f32 %v3896_v26, %v4838_v30 }
 0x33d   : > { %v3898_v23 = vpop.eup %3897 }
 0x33e   : > { %2704 = vst [vmem:[%s4859_s14 + $0x20] sm:$0xff] %v2696_v40  ;;  %v2699_v27 = vadd.f32 %v2689_v33, %v2545_v28  ;;  %v2544_v48 = vmul.f32 %v3898_v23, %v4842_v34 }
 0x340   : > { %2707 = vst [vmem:[%s4859_s14 + $0x38] sm:$0xff] %v2699_v27  ;;  %v2698_v37 = vadd.f32 %v2684_v18, %v2544_v48 }
 0x342   : > { %2706 = vst [vmem:[%s4859_s14 + $0x30] sm:$0xff] %v2698_v37 }
 0x343 PF: > { %s19_s11 = sadd.s32 1, %s3922_s11   ;;  %s4909_s30 = smov %s3918_s10 }
 0x344   : > { %p16_p5 = scmp.ge.s32.totalorder %s19_s11, 4   ;;  %s4910_s10 = smov %s4912_s12 }
 0x346   :  { %18 = sbr.rel (!%p16_p5) target bundleno = 2 (0x2), region = 100 }

</bundles_post_ra>
